<compile_context>
chip_gen: v7x
topology: tpu7x:2x2x1
jax: 0.10.0
libtpu: 0.0.40
codegen_flags: <defaults>
</compile_context>

<pallas_src>
import math

import jax
import jax.numpy as jnp
from jax.experimental import pallas as pl
from jax.experimental.pallas import tpu as pltpu

D_MODEL = 32
NHEAD = 4
HEAD_DIM = D_MODEL // NHEAD
DIM_FF = 64
EPS = 1e-5                    # nn.LayerNorm default eps
HC = NHEAD * D_MODEL          # 128: one (C,C) block per head, packed along lanes


# ---------------------------------------------------------------------------
# shared math
# ---------------------------------------------------------------------------
def _layernorm(x, gamma, beta):
    mu = jnp.mean(x, axis=-1, keepdims=True)
    var = jnp.mean(jnp.square(x - mu), axis=-1, keepdims=True)
    return (x - mu) * jax.lax.rsqrt(var + EPS) * gamma + beta


# ---------------------------------------------------------------------------
# Pallas kernel: whole layer fused, everything resident in VMEM, no grid.
# ---------------------------------------------------------------------------
def decoder_layer_kernel(q_ref, k_ref, attn_w_ref, qk_b_ref,
                         ffn_w1_ref, ffn_b1_ref, ffn_w2_ref, vec_ref, out_ref):
    B, C, Pq = q_ref.shape
    Pk = k_ref.shape[2]
    H = NHEAD

    # ---- fold the caller layout in: (B, C, P) -> token-major (B*P, C) -------------
    # per-batch 2-D transposes (XLU, otherwise idle); B is tiny and static.
    xq = jnp.concatenate([q_ref[b].T for b in range(B)], axis=0)   # (B*Pq, C)
    xk = jnp.concatenate([k_ref[b].T for b in range(B)], axis=0)   # (B*Pk, C)

    def head_stack(flat, n_rows):
        """(B*n, H*C) lane-packed -> (H*B, n, C) head-major batch stack (g = h*B + b)."""
        parts = [flat[:, h * C:(h + 1) * C] for h in range(H)]
        return jnp.concatenate(parts, axis=0).reshape(H * B, n_rows, C)

    def mha(qa_flat, keys_g, vo_g, out_bias):
        """Batched-head attention: one score dot, one softmax, one PV dot, one head-sum."""
        n_k = keys_g.shape[1]
        qa_g = head_stack(qa_flat, Pq)                               # (H*B, Pq, C)
        s = jnp.einsum('gqc,gkc->gqk', qa_g, keys_g,
                       preferred_element_type=jnp.float32)           # (H*B, Pq, n_k)
        s = s - jnp.max(s, axis=-1, keepdims=True)
        p = jnp.exp(s)
        p = p * pl.reciprocal(jnp.sum(p, axis=-1, keepdims=True), approx=True)
        pv = jnp.einsum('gqk,gkc->gqc', p, vo_g,
                        preferred_element_type=jnp.float32)          # (H*B, Pq, C)
        acc = jnp.sum(pv.reshape(H, B, Pq, C), axis=0)               # (B, Pq, C)
        return acc.reshape(B * Pq, C) + out_bias

    # ---- up-front projections (merged shared-LHS dots; cross-V off critical path) --
    self_proj = jnp.dot(xq, attn_w_ref[:, 0:2 * HC],
                        preferred_element_type=jnp.float32)          # (B*Pq, 256)
    qa_self = self_proj[:, 0:HC] + qk_b_ref[0:1, :]                  # (B*Pq, 128)
    vo_self = self_proj[:, HC:2 * HC]                                # (B*Pq, 128)
    vo_cross = jnp.dot(xk, attn_w_ref[:, 3 * HC:4 * HC],
                       preferred_element_type=jnp.float32)           # (B*Pk, 128)

    # head-major stacks that depend only on kernel inputs (hoisted, built once)
    keys_self_g = jnp.concatenate([xq.reshape(B, Pq, C)] * H, axis=0)    # (H*B, Pq, C)
    keys_cross_g = jnp.concatenate([xk.reshape(B, Pk, C)] * H, axis=0)   # (H*B, Pk, C)
    vo_self_g = head_stack(vo_self, Pq)                                  # (H*B, Pq, C)
    vo_cross_g = head_stack(vo_cross, Pk)                                # (H*B, Pk, C)

    # ---- self-attention block (dropout1 = identity) ---------------------------------
    x = xq + mha(qa_self, keys_self_g, vo_self_g, vec_ref[0:1, :])
    x = _layernorm(x, vec_ref[3:4, :], vec_ref[4:5, :])

    # ---- cross-attention block (dropout2 = identity) --------------------------------
    qa_cross = jnp.dot(x, attn_w_ref[:, 2 * HC:3 * HC],
                       preferred_element_type=jnp.float32) + qk_b_ref[1:2, :]
    x = x + mha(qa_cross, keys_cross_g, vo_cross_g, vec_ref[1:2, :])
    x = _layernorm(x, vec_ref[5:6, :], vec_ref[6:7, :])

    # ---- feed-forward block (relu, dropout/dropout3 = identity) ---------------------
    h = jnp.maximum(
        jnp.dot(x, ffn_w1_ref[...], preferred_element_type=jnp.float32)
        + ffn_b1_ref[...], 0.0)
    x = x + jnp.dot(h, ffn_w2_ref[...], preferred_element_type=jnp.float32) \
          + vec_ref[2:3, :]
    x = _layernorm(x, vec_ref[7:8, :], vec_ref[8:9, :])

    # ---- write back in the caller's native (B, C, Pq) layout ------------------------
    xb = x.reshape(B, Pq, C)
    for b in range(B):
        out_ref[b] = xb[b].T                                        # (C, Pq) per batch


# ---------------------------------------------------------------------------
# wrapper: a single device op (transposes live inside the kernel)
# ---------------------------------------------------------------------------
def transformer_decoder_layer(query_bcp, key_bck, packed):
    """query_bcp: (B, C, Pq), key_bck: (B, C, Pk) -> (B, C, Pq)."""
    B, C, Pq = query_bcp.shape
    return pl.pallas_call(
        decoder_layer_kernel,
        out_shape=jax.ShapeDtypeStruct((B, C, Pq), jnp.float32),
        compiler_params=pltpu.CompilerParams(vmem_limit_bytes=32 * 1024 * 1024),
    )(query_bcp.astype(jnp.float32), key_bck.astype(jnp.float32),
      packed['attn_w'], packed['qk_b'], packed['ffn_w1'],
      packed['ffn_b1'], packed['ffn_w2'], packed['vec'])


transformer_decoder_layer = jax.jit(transformer_decoder_layer)


# ---------------------------------------------------------------------------
# host-side weight packing (raw torch-style params -> 6 packed arrays)
# ---------------------------------------------------------------------------
def pack_params(raw):
    C, H, hd = D_MODEL, NHEAD, HEAD_DIM
    scale = 1.0 / math.sqrt(hd)

    def attn_pack(wq, bq, wk, bk, wv, bv, wo, bo):
        qk_w, vo_w, qk_b = [], [], []
        for h in range(H):
            sl = slice(h * hd, (h + 1) * hd)
            qk_w.append(scale * (wq[:, sl] @ wk[:, sl].T))   # (C, C)
            vo_w.append(wv[:, sl] @ wo[sl, :])               # (C, C)
            qk_b.append(scale * (wk[:, sl] @ bq[sl]))        # (C,)
        return (jnp.concatenate(qk_w, axis=1),               # (C, H*C)
                jnp.concatenate(vo_w, axis=1),               # (C, H*C)
                jnp.concatenate(qk_b, axis=0),               # (H*C,)
                bv @ wo + bo)                                # (C,)

    s_qk_w, s_vo_w, s_qk_b, s_out_b = attn_pack(
        raw['s_wq'], raw['s_bq'], raw['s_wk'], raw['s_bk'],
        raw['s_wv'], raw['s_bv'], raw['s_wo'], raw['s_bo'])
    c_qk_w, c_vo_w, c_qk_b, c_out_b = attn_pack(
        raw['c_wq'], raw['c_bq'], raw['c_wk'], raw['c_bk'],
        raw['c_wv'], raw['c_bv'], raw['c_wo'], raw['c_bo'])

    attn_w = jnp.concatenate([s_qk_w, s_vo_w, c_qk_w, c_vo_w], axis=1)   # (32, 512)
    qk_b = jnp.stack([s_qk_b, c_qk_b], axis=0)                            # (2, 128)
    vec = jnp.stack([s_out_b, c_out_b, raw['b2'],
                     raw['g1'], raw['be1'], raw['g2'], raw['be2'],
                     raw['g3'], raw['be3']], axis=0)                      # (9, 32)
    return dict(attn_w=attn_w, qk_b=qk_b,
                ffn_w1=raw['w1'], ffn_b1=raw['b1'][None, :], ffn_w2=raw['w2'],
                vec=vec)


# ---------------------------------------------------------------------------
# deterministic synthetic raw parameters (torch-style; weights stored (in, out))
# ---------------------------------------------------------------------------
def make_raw_params(key, d_model=D_MODEL, dim_ff=DIM_FF):
    keys = iter(jax.random.split(key, 40))

    def w(shape, scale=0.05):
        return (scale * jax.random.normal(next(keys), shape)).astype(jnp.float32)

    p = {}
    for pre in ('s_', 'c_'):
        p[pre + 'wq'] = w((d_model, d_model))
        p[pre + 'wk'] = w((d_model, d_model))
        p[pre + 'wv'] = w((d_model, d_model))
        p[pre + 'bq'] = w((d_model,), 0.02)
        p[pre + 'bk'] = w((d_model,), 0.02)
        p[pre + 'bv'] = w((d_model,), 0.02)
        p[pre + 'wo'] = w((d_model, d_model))
        p[pre + 'bo'] = w((d_model,), 0.02)
    p['w1'] = w((d_model, dim_ff))
    p['b1'] = w((dim_ff,), 0.02)
    p['w2'] = w((dim_ff, d_model))
    p['b2'] = w((d_model,), 0.02)
    for g, b in (('g1', 'be1'), ('g2', 'be2'), ('g3', 'be3')):
        p[g] = jnp.ones((d_model,), jnp.float32)
        p[b] = jnp.zeros((d_model,), jnp.float32)
    return p


# ---------------------------------------------------------------------------
# pure-JAX reference: STANDARD (unfolded) MHA formulation from the raw weights.
# Cross-validates the packed/reparametrized kernel against the original math.
# ---------------------------------------------------------------------------
def _mha_ref(xq, xkv, wq, bq, wk, bk, wv, bv, wo, bo):
    hd = HEAD_DIM
    scale = 1.0 / math.sqrt(hd)
    qp = xq @ wq + bq
    kp = xkv @ wk + bk
    vp = xkv @ wv + bv
    outs = []
    for h in range(NHEAD):
        sl = slice(h * hd, (h + 1) * hd)
        s = (qp[:, sl] * scale) @ kp[:, sl].T
        s = s - jnp.max(s, axis=-1, keepdims=True)
        p = jnp.exp(s)
        p = p / jnp.sum(p, axis=-1, keepdims=True)
        outs.append(p @ vp[:, sl])
    return jnp.concatenate(outs, axis=-1) @ wo + bo


def _layer_ref(xq, xk, r):
    x = xq + _mha_ref(xq, xq, r['s_wq'], r['s_bq'], r['s_wk'], r['s_bk'],
                      r['s_wv'], r['s_bv'], r['s_wo'], r['s_bo'])
    x = _layernorm(x, r['g1'], r['be1'])
    x = x + _mha_ref(x, xk, r['c_wq'], r['c_bq'], r['c_wk'], r['c_bk'],
                     r['c_wv'], r['c_bv'], r['c_wo'], r['c_bo'])
    x = _layernorm(x, r['g2'], r['be2'])
    h = jnp.maximum(x @ r['w1'] + r['b1'], 0.0)
    x = x + h @ r['w2'] + r['b2']
    x = _layernorm(x, r['g3'], r['be3'])
    return x


def reference(query_bcp, key_bck, raw):
    q = jnp.transpose(query_bcp, (0, 2, 1)).astype(jnp.float32)
    k = jnp.transpose(key_bck, (0, 2, 1)).astype(jnp.float32)
    outs = [_layer_ref(q[b], k[b], raw) for b in range(q.shape[0])]
    return jnp.transpose(jnp.stack(outs, axis=0), (0, 2, 1))


if __name__ == "__main__":
    B, C, Pq, Pk = 2, D_MODEL, 8, 16
    root = jax.random.PRNGKey(0)
    kq, kk, kp = jax.random.split(root, 3)
    query = jax.random.normal(kq, (B, C, Pq), jnp.float32)    # B C Pq
    key = jax.random.normal(kk, (B, C, Pk), jnp.float32)      # B C Pk
    raw = make_raw_params(kp)
    packed = pack_params(raw)

    out = transformer_decoder_layer(query, key, packed)
    out = jax.block_until_ready(out)

    ref = reference(query, key, raw)
    assert out.shape == (B, C, Pq)
    err = float(jnp.max(jnp.abs(out - ref)))
    assert jnp.allclose(out, ref, atol=1e-3, rtol=1e-3), f"mismatch vs reference, max err {err}"

    print("KERNEL_OK")
</pallas_src>

<mosaic_0001>
module attributes {stable_mosaic.version = 11 : i64} {
  func.func @decoder_layer_kernel(%arg0: memref<2x32x8xf32, #tpu.memory_space<vmem>>, %arg1: memref<2x32x16xf32, #tpu.memory_space<vmem>>, %arg2: memref<32x512xf32, #tpu.memory_space<vmem>>, %arg3: memref<2x128xf32, #tpu.memory_space<vmem>>, %arg4: memref<32x64xf32, #tpu.memory_space<vmem>>, %arg5: memref<1x64xf32, #tpu.memory_space<vmem>>, %arg6: memref<64x32xf32, #tpu.memory_space<vmem>>, %arg7: memref<9x32xf32, #tpu.memory_space<vmem>>, %arg8: memref<2x32x8xf32, #tpu.memory_space<vmem>>) attributes {dimension_semantics = [], scalar_prefetch = 0 : i64, scratch_operands = 0 : i64, tpu.core_type = #tpu.core_type<tc>} {
    %c0 = arith.constant 0 : index
    %c0_0 = arith.constant 0 : index
    %c0_1 = arith.constant 0 : index
    %0 = vector.load %arg0[%c0, %c0_0, %c0_1] : memref<2x32x8xf32, #tpu.memory_space<vmem>>, vector<1x32x8xf32>
    %1 = vector.shape_cast %0 : vector<1x32x8xf32> to vector<32x8xf32>
    %2 = tpu.transpose %1, [1, 0] : vector<32x8xf32> -> vector<8x32xf32>
    %c1 = arith.constant 1 : index
    %c0_2 = arith.constant 0 : index
    %c0_3 = arith.constant 0 : index
    %3 = vector.load %arg0[%c1, %c0_2, %c0_3] : memref<2x32x8xf32, #tpu.memory_space<vmem>>, vector<1x32x8xf32>
    %4 = vector.shape_cast %3 : vector<1x32x8xf32> to vector<32x8xf32>
    %5 = tpu.transpose %4, [1, 0] : vector<32x8xf32> -> vector<8x32xf32>
    %6 = tpu.concatenate %2, %5 in 0 : vector<8x32xf32>, vector<8x32xf32> -> vector<16x32xf32>
    %c0_4 = arith.constant 0 : index
    %c0_5 = arith.constant 0 : index
    %c0_6 = arith.constant 0 : index
    %7 = vector.load %arg1[%c0_4, %c0_5, %c0_6] : memref<2x32x16xf32, #tpu.memory_space<vmem>>, vector<1x32x16xf32>
    %8 = vector.shape_cast %7 : vector<1x32x16xf32> to vector<32x16xf32>
    %9 = tpu.transpose %8, [1, 0] : vector<32x16xf32> -> vector<16x32xf32>
    %c1_7 = arith.constant 1 : index
    %c0_8 = arith.constant 0 : index
    %c0_9 = arith.constant 0 : index
    %10 = vector.load %arg1[%c1_7, %c0_8, %c0_9] : memref<2x32x16xf32, #tpu.memory_space<vmem>>, vector<1x32x16xf32>
    %11 = vector.shape_cast %10 : vector<1x32x16xf32> to vector<32x16xf32>
    %12 = tpu.transpose %11, [1, 0] : vector<32x16xf32> -> vector<16x32xf32>
    %13 = tpu.concatenate %9, %12 in 0 : vector<16x32xf32>, vector<16x32xf32> -> vector<32x32xf32>
    %c0_10 = arith.constant 0 : index
    %c0_11 = arith.constant 0 : index
    %14 = vector.load %arg2[%c0_10, %c0_11] : memref<32x512xf32, #tpu.memory_space<vmem>>, vector<32x256xf32>
    %cst = arith.constant dense<0.000000e+00> : vector<16x256xf32>
    %15 = tpu.matmul %6, %14, %cst {dimension_numbers = #tpu.dot_dimension_numbers<[1], [0], [0], [1], [0, 0, 1, 1], [], []>} : vector<16x32xf32>, vector<32x256xf32>, vector<16x256xf32> -> vector<16x256xf32>
    %16 = vector.extract_strided_slice %15 {offsets = [0, 0], sizes = [16, 128], strides = [1, 1]} : vector<16x256xf32> to vector<16x128xf32>
    %c0_12 = arith.constant 0 : index
    %c0_13 = arith.constant 0 : index
    %17 = vector.load %arg3[%c0_12, %c0_13] : memref<2x128xf32, #tpu.memory_space<vmem>>, vector<1x128xf32>
    %18 = vector.broadcast %17 : vector<1x128xf32> to vector<16x128xf32>
    %19 = arith.addf %16, %18 : vector<16x128xf32>
    %20 = vector.extract_strided_slice %15 {offsets = [0, 128], sizes = [16, 128], strides = [1, 1]} : vector<16x256xf32> to vector<16x128xf32>
    %c0_14 = arith.constant 0 : index
    %c384 = arith.constant 384 : index
    %21 = vector.load %arg2[%c0_14, %c384] : memref<32x512xf32, #tpu.memory_space<vmem>>, vector<32x128xf32>
    %cst_15 = arith.constant dense<0.000000e+00> : vector<32x128xf32>
    %22 = tpu.matmul %13, %21, %cst_15 {dimension_numbers = #tpu.dot_dimension_numbers<[1], [0], [0], [1], [0, 0, 1, 1], [], []>} : vector<32x32xf32>, vector<32x128xf32>, vector<32x128xf32> -> vector<32x128xf32>
    %23 = vector.shape_cast %6 : vector<16x32xf32> to vector<2x8x32xf32>
    %24 = tpu.concatenate %23, %23, %23, %23 in 0 : vector<2x8x32xf32>, vector<2x8x32xf32>, vector<2x8x32xf32>, vector<2x8x32xf32> -> vector<8x8x32xf32>
    %25 = vector.shape_cast %13 : vector<32x32xf32> to vector<2x16x32xf32>
    %26 = tpu.concatenate %25, %25, %25, %25 in 0 : vector<2x16x32xf32>, vector<2x16x32xf32>, vector<2x16x32xf32>, vector<2x16x32xf32> -> vector<8x16x32xf32>
    %27 = vector.extract_strided_slice %20 {offsets = [0, 0], sizes = [16, 32], strides = [1, 1]} : vector<16x128xf32> to vector<16x32xf32>
    %28 = vector.extract_strided_slice %20 {offsets = [0, 32], sizes = [16, 32], strides = [1, 1]} : vector<16x128xf32> to vector<16x32xf32>
    %29 = vector.extract_strided_slice %20 {offsets = [0, 64], sizes = [16, 32], strides = [1, 1]} : vector<16x128xf32> to vector<16x32xf32>
    %30 = vector.extract_strided_slice %20 {offsets = [0, 96], sizes = [16, 32], strides = [1, 1]} : vector<16x128xf32> to vector<16x32xf32>
    %31 = tpu.concatenate %27, %28, %29, %30 in 0 : vector<16x32xf32>, vector<16x32xf32>, vector<16x32xf32>, vector<16x32xf32> -> vector<64x32xf32>
    %32 = vector.shape_cast %31 : vector<64x32xf32> to vector<8x8x32xf32>
    %33 = vector.extract_strided_slice %22 {offsets = [0, 0], sizes = [32, 32], strides = [1, 1]} : vector<32x128xf32> to vector<32x32xf32>
    %34 = vector.extract_strided_slice %22 {offsets = [0, 32], sizes = [32, 32], strides = [1, 1]} : vector<32x128xf32> to vector<32x32xf32>
    %35 = vector.extract_strided_slice %22 {offsets = [0, 64], sizes = [32, 32], strides = [1, 1]} : vector<32x128xf32> to vector<32x32xf32>
    %36 = vector.extract_strided_slice %22 {offsets = [0, 96], sizes = [32, 32], strides = [1, 1]} : vector<32x128xf32> to vector<32x32xf32>
    %37 = tpu.concatenate %33, %34, %35, %36 in 0 : vector<32x32xf32>, vector<32x32xf32>, vector<32x32xf32>, vector<32x32xf32> -> vector<128x32xf32>
    %38 = vector.shape_cast %37 : vector<128x32xf32> to vector<8x16x32xf32>
    %c0_16 = arith.constant 0 : index
    %c0_17 = arith.constant 0 : index
    %39 = vector.load %arg7[%c0_16, %c0_17] : memref<9x32xf32, #tpu.memory_space<vmem>>, vector<1x32xf32>
    %40 = vector.extract_strided_slice %19 {offsets = [0, 0], sizes = [16, 32], strides = [1, 1]} : vector<16x128xf32> to vector<16x32xf32>
    %41 = vector.extract_strided_slice %19 {offsets = [0, 32], sizes = [16, 32], strides = [1, 1]} : vector<16x128xf32> to vector<16x32xf32>
    %42 = vector.extract_strided_slice %19 {offsets = [0, 64], sizes = [16, 32], strides = [1, 1]} : vector<16x128xf32> to vector<16x32xf32>
    %43 = vector.extract_strided_slice %19 {offsets = [0, 96], sizes = [16, 32], strides = [1, 1]} : vector<16x128xf32> to vector<16x32xf32>
    %44 = tpu.concatenate %40, %41, %42, %43 in 0 : vector<16x32xf32>, vector<16x32xf32>, vector<16x32xf32>, vector<16x32xf32> -> vector<64x32xf32>
    %45 = vector.shape_cast %44 : vector<64x32xf32> to vector<8x8x32xf32>
    "tpu.trace_start"() <{level = 10 : i32, message = "gqc,gkc->gqk"}> : () -> ()
    %cst_18 = arith.constant dense<0.000000e+00> : vector<8x8x8xf32>
    %46 = tpu.matmul %45, %24, %cst_18 {dimension_numbers = #tpu.dot_dimension_numbers<[2], [2], [1], [1], [0, 0, 0, 1, 1, 1], [0], [0]>} : vector<8x8x32xf32>, vector<8x8x32xf32>, vector<8x8x8xf32> -> vector<8x8x8xf32>
    "tpu.trace_stop"() : () -> ()
    %cst_19 = arith.constant dense<0xFF800000> : vector<8x8xf32>
    %47 = vector.multi_reduction <maximumf>, %46, %cst_19 [2] : vector<8x8x8xf32> to vector<8x8xf32>
    %48 = vector.shape_cast %47 : vector<8x8xf32> to vector<8x8x1xf32>
    %49 = vector.broadcast %48 : vector<8x8x1xf32> to vector<8x8x8xf32>
    %50 = arith.subf %46, %49 : vector<8x8x8xf32>
    %51 = math.exp %50 : vector<8x8x8xf32>
    %cst_20 = arith.constant dense<0.000000e+00> : vector<8x8xf32>
    %52 = vector.multi_reduction <add>, %51, %cst_20 [2] : vector<8x8x8xf32> to vector<8x8xf32>
    %53 = vector.shape_cast %52 : vector<8x8xf32> to vector<8x8x1xf32>
    %54 = tpu.reciprocal %53 {approx = true} : vector<8x8x1xf32> -> vector<8x8x1xf32>
    %55 = vector.broadcast %54 : vector<8x8x1xf32> to vector<8x8x8xf32>
    %56 = arith.mulf %51, %55 : vector<8x8x8xf32>
    "tpu.trace_start"() <{level = 10 : i32, message = "gqk,gkc->gqc"}> : () -> ()
    %cst_21 = arith.constant dense<0.000000e+00> : vector<8x8x32xf32>
    %57 = tpu.matmul %56, %32, %cst_21 {dimension_numbers = #tpu.dot_dimension_numbers<[2], [1], [1], [2], [0, 0, 0, 1, 1, 2], [0], [0]>} : vector<8x8x8xf32>, vector<8x8x32xf32>, vector<8x8x32xf32> -> vector<8x8x32xf32>
    "tpu.trace_stop"() : () -> ()
    %58 = vector.shape_cast %57 : vector<8x8x32xf32> to vector<4x2x8x32xf32>
    %cst_22 = arith.constant dense<0.000000e+00> : vector<2x8x32xf32>
    %59 = vector.multi_reduction <add>, %58, %cst_22 [0] : vector<4x2x8x32xf32> to vector<2x8x32xf32>
    %60 = vector.shape_cast %59 : vector<2x8x32xf32> to vector<16x32xf32>
    %61 = vector.broadcast %39 : vector<1x32xf32> to vector<16x32xf32>
    %62 = arith.addf %60, %61 : vector<16x32xf32>
    %63 = arith.addf %6, %62 : vector<16x32xf32>
    %c3 = arith.constant 3 : index
    %c0_23 = arith.constant 0 : index
    %64 = vector.load %arg7[%c3, %c0_23] : memref<9x32xf32, #tpu.memory_space<vmem>>, vector<1x32xf32>
    %c4 = arith.constant 4 : index
    %c0_24 = arith.constant 0 : index
    %65 = vector.load %arg7[%c4, %c0_24] : memref<9x32xf32, #tpu.memory_space<vmem>>, vector<1x32xf32>
    %cst_25 = arith.constant dense<0.000000e+00> : vector<16xf32>
    %66 = vector.multi_reduction <add>, %63, %cst_25 [1] : vector<16x32xf32> to vector<16xf32>
    %67 = vector.shape_cast %66 : vector<16xf32> to vector<16x1xf32>
    %cst_26 = arith.constant 3.200000e+01 : f32
    %68 = vector.broadcast %cst_26 : f32 to vector<16x1xf32>
    %69 = arith.divf %67, %68 : vector<16x1xf32>
    %70 = vector.broadcast %69 : vector<16x1xf32> to vector<16x32xf32>
    %71 = arith.subf %63, %70 : vector<16x32xf32>
    %72 = arith.mulf %71, %71 : vector<16x32xf32>
    %cst_27 = arith.constant dense<0.000000e+00> : vector<16xf32>
    %73 = vector.multi_reduction <add>, %72, %cst_27 [1] : vector<16x32xf32> to vector<16xf32>
    %74 = vector.shape_cast %73 : vector<16xf32> to vector<16x1xf32>
    %cst_28 = arith.constant 3.200000e+01 : f32
    %75 = vector.broadcast %cst_28 : f32 to vector<16x1xf32>
    %76 = arith.divf %74, %75 : vector<16x1xf32>
    %77 = vector.broadcast %69 : vector<16x1xf32> to vector<16x32xf32>
    %78 = arith.subf %63, %77 : vector<16x32xf32>
    %cst_29 = arith.constant 9.99999974E-6 : f32
    %79 = vector.broadcast %cst_29 : f32 to vector<16x1xf32>
    %80 = arith.addf %76, %79 : vector<16x1xf32>
    %81 = math.rsqrt %80 : vector<16x1xf32>
    %82 = vector.broadcast %81 : vector<16x1xf32> to vector<16x32xf32>
    %83 = arith.mulf %78, %82 : vector<16x32xf32>
    %84 = vector.broadcast %64 : vector<1x32xf32> to vector<16x32xf32>
    %85 = arith.mulf %83, %84 : vector<16x32xf32>
    %86 = vector.broadcast %65 : vector<1x32xf32> to vector<16x32xf32>
    %87 = arith.addf %85, %86 : vector<16x32xf32>
    %c0_30 = arith.constant 0 : index
    %c256 = arith.constant 256 : index
    %88 = vector.load %arg2[%c0_30, %c256] : memref<32x512xf32, #tpu.memory_space<vmem>>, vector<32x128xf32>
    %cst_31 = arith.constant dense<0.000000e+00> : vector<16x128xf32>
    %89 = tpu.matmul %87, %88, %cst_31 {dimension_numbers = #tpu.dot_dimension_numbers<[1], [0], [0], [1], [0, 0, 1, 1], [], []>} : vector<16x32xf32>, vector<32x128xf32>, vector<16x128xf32> -> vector<16x128xf32>
    %c1_32 = arith.constant 1 : index
    %c0_33 = arith.constant 0 : index
    %90 = vector.load %arg3[%c1_32, %c0_33] : memref<2x128xf32, #tpu.memory_space<vmem>>, vector<1x128xf32>
    %91 = vector.broadcast %90 : vector<1x128xf32> to vector<16x128xf32>
    %92 = arith.addf %89, %91 : vector<16x128xf32>
    %c1_34 = arith.constant 1 : index
    %c0_35 = arith.constant 0 : index
    %93 = vector.load %arg7[%c1_34, %c0_35] : memref<9x32xf32, #tpu.memory_space<vmem>>, vector<1x32xf32>
    %94 = vector.extract_strided_slice %92 {offsets = [0, 0], sizes = [16, 32], strides = [1, 1]} : vector<16x128xf32> to vector<16x32xf32>
    %95 = vector.extract_strided_slice %92 {offsets = [0, 32], sizes = [16, 32], strides = [1, 1]} : vector<16x128xf32> to vector<16x32xf32>
    %96 = vector.extract_strided_slice %92 {offsets = [0, 64], sizes = [16, 32], strides = [1, 1]} : vector<16x128xf32> to vector<16x32xf32>
    %97 = vector.extract_strided_slice %92 {offsets = [0, 96], sizes = [16, 32], strides = [1, 1]} : vector<16x128xf32> to vector<16x32xf32>
    %98 = tpu.concatenate %94, %95, %96, %97 in 0 : vector<16x32xf32>, vector<16x32xf32>, vector<16x32xf32>, vector<16x32xf32> -> vector<64x32xf32>
    %99 = vector.shape_cast %98 : vector<64x32xf32> to vector<8x8x32xf32>
    "tpu.trace_start"() <{level = 10 : i32, message = "gqc,gkc->gqk"}> : () -> ()
    %cst_36 = arith.constant dense<0.000000e+00> : vector<8x8x16xf32>
    %100 = tpu.matmul %99, %26, %cst_36 {dimension_numbers = #tpu.dot_dimension_numbers<[2], [2], [1], [1], [0, 0, 0, 1, 1, 1], [0], [0]>} : vector<8x8x32xf32>, vector<8x16x32xf32>, vector<8x8x16xf32> -> vector<8x8x16xf32>
    "tpu.trace_stop"() : () -> ()
    %cst_37 = arith.constant dense<0xFF800000> : vector<8x8xf32>
    %101 = vector.multi_reduction <maximumf>, %100, %cst_37 [2] : vector<8x8x16xf32> to vector<8x8xf32>
    %102 = vector.shape_cast %101 : vector<8x8xf32> to vector<8x8x1xf32>
    %103 = vector.broadcast %102 : vector<8x8x1xf32> to vector<8x8x16xf32>
    %104 = arith.subf %100, %103 : vector<8x8x16xf32>
    %105 = math.exp %104 : vector<8x8x16xf32>
    %cst_38 = arith.constant dense<0.000000e+00> : vector<8x8xf32>
    %106 = vector.multi_reduction <add>, %105, %cst_38 [2] : vector<8x8x16xf32> to vector<8x8xf32>
    %107 = vector.shape_cast %106 : vector<8x8xf32> to vector<8x8x1xf32>
    %108 = tpu.reciprocal %107 {approx = true} : vector<8x8x1xf32> -> vector<8x8x1xf32>
    %109 = vector.broadcast %108 : vector<8x8x1xf32> to vector<8x8x16xf32>
    %110 = arith.mulf %105, %109 : vector<8x8x16xf32>
    "tpu.trace_start"() <{level = 10 : i32, message = "gqk,gkc->gqc"}> : () -> ()
    %cst_39 = arith.constant dense<0.000000e+00> : vector<8x8x32xf32>
    %111 = tpu.matmul %110, %38, %cst_39 {dimension_numbers = #tpu.dot_dimension_numbers<[2], [1], [1], [2], [0, 0, 0, 1, 1, 2], [0], [0]>} : vector<8x8x16xf32>, vector<8x16x32xf32>, vector<8x8x32xf32> -> vector<8x8x32xf32>
    "tpu.trace_stop"() : () -> ()
    %112 = vector.shape_cast %111 : vector<8x8x32xf32> to vector<4x2x8x32xf32>
    %cst_40 = arith.constant dense<0.000000e+00> : vector<2x8x32xf32>
    %113 = vector.multi_reduction <add>, %112, %cst_40 [0] : vector<4x2x8x32xf32> to vector<2x8x32xf32>
    %114 = vector.shape_cast %113 : vector<2x8x32xf32> to vector<16x32xf32>
    %115 = vector.broadcast %93 : vector<1x32xf32> to vector<16x32xf32>
    %116 = arith.addf %114, %115 : vector<16x32xf32>
    %117 = arith.addf %87, %116 : vector<16x32xf32>
    %c5 = arith.constant 5 : index
    %c0_41 = arith.constant 0 : index
    %118 = vector.load %arg7[%c5, %c0_41] : memref<9x32xf32, #tpu.memory_space<vmem>>, vector<1x32xf32>
    %c6 = arith.constant 6 : index
    %c0_42 = arith.constant 0 : index
    %119 = vector.load %arg7[%c6, %c0_42] : memref<9x32xf32, #tpu.memory_space<vmem>>, vector<1x32xf32>
    %cst_43 = arith.constant dense<0.000000e+00> : vector<16xf32>
    %120 = vector.multi_reduction <add>, %117, %cst_43 [1] : vector<16x32xf32> to vector<16xf32>
    %121 = vector.shape_cast %120 : vector<16xf32> to vector<16x1xf32>
    %cst_44 = arith.constant 3.200000e+01 : f32
    %122 = vector.broadcast %cst_44 : f32 to vector<16x1xf32>
    %123 = arith.divf %121, %122 : vector<16x1xf32>
    %124 = vector.broadcast %123 : vector<16x1xf32> to vector<16x32xf32>
    %125 = arith.subf %117, %124 : vector<16x32xf32>
    %126 = arith.mulf %125, %125 : vector<16x32xf32>
    %cst_45 = arith.constant dense<0.000000e+00> : vector<16xf32>
    %127 = vector.multi_reduction <add>, %126, %cst_45 [1] : vector<16x32xf32> to vector<16xf32>
    %128 = vector.shape_cast %127 : vector<16xf32> to vector<16x1xf32>
    %cst_46 = arith.constant 3.200000e+01 : f32
    %129 = vector.broadcast %cst_46 : f32 to vector<16x1xf32>
    %130 = arith.divf %128, %129 : vector<16x1xf32>
    %131 = vector.broadcast %123 : vector<16x1xf32> to vector<16x32xf32>
    %132 = arith.subf %117, %131 : vector<16x32xf32>
    %cst_47 = arith.constant 9.99999974E-6 : f32
    %133 = vector.broadcast %cst_47 : f32 to vector<16x1xf32>
    %134 = arith.addf %130, %133 : vector<16x1xf32>
    %135 = math.rsqrt %134 : vector<16x1xf32>
    %136 = vector.broadcast %135 : vector<16x1xf32> to vector<16x32xf32>
    %137 = arith.mulf %132, %136 : vector<16x32xf32>
    %138 = vector.broadcast %118 : vector<1x32xf32> to vector<16x32xf32>
    %139 = arith.mulf %137, %138 : vector<16x32xf32>
    %140 = vector.broadcast %119 : vector<1x32xf32> to vector<16x32xf32>
    %141 = arith.addf %139, %140 : vector<16x32xf32>
    %c0_48 = arith.constant 0 : index
    %c0_49 = arith.constant 0 : index
    %142 = vector.load %arg4[%c0_48, %c0_49] : memref<32x64xf32, #tpu.memory_space<vmem>>, vector<32x64xf32>
    %cst_50 = arith.constant dense<0.000000e+00> : vector<16x64xf32>
    %143 = tpu.matmul %141, %142, %cst_50 {dimension_numbers = #tpu.dot_dimension_numbers<[1], [0], [0], [1], [0, 0, 1, 1], [], []>} : vector<16x32xf32>, vector<32x64xf32>, vector<16x64xf32> -> vector<16x64xf32>
    %c0_51 = arith.constant 0 : index
    %c0_52 = arith.constant 0 : index
    %144 = vector.load %arg5[%c0_51, %c0_52] : memref<1x64xf32, #tpu.memory_space<vmem>>, vector<1x64xf32>
    %145 = vector.broadcast %144 : vector<1x64xf32> to vector<16x64xf32>
    %146 = arith.addf %143, %145 : vector<16x64xf32>
    %cst_53 = arith.constant 0.000000e+00 : f32
    %147 = vector.broadcast %cst_53 : f32 to vector<16x64xf32>
    %148 = arith.maximumf %146, %147 : vector<16x64xf32>
    %c0_54 = arith.constant 0 : index
    %c0_55 = arith.constant 0 : index
    %149 = vector.load %arg6[%c0_54, %c0_55] : memref<64x32xf32, #tpu.memory_space<vmem>>, vector<64x32xf32>
    %cst_56 = arith.constant dense<0.000000e+00> : vector<16x32xf32>
    %150 = tpu.matmul %148, %149, %cst_56 {dimension_numbers = #tpu.dot_dimension_numbers<[1], [0], [0], [1], [0, 0, 1, 1], [], []>} : vector<16x64xf32>, vector<64x32xf32>, vector<16x32xf32> -> vector<16x32xf32>
    %151 = arith.addf %141, %150 : vector<16x32xf32>
    %c2 = arith.constant 2 : index
    %c0_57 = arith.constant 0 : index
    %152 = vector.load %arg7[%c2, %c0_57] : memref<9x32xf32, #tpu.memory_space<vmem>>, vector<1x32xf32>
    %153 = vector.broadcast %152 : vector<1x32xf32> to vector<16x32xf32>
    %154 = arith.addf %151, %153 : vector<16x32xf32>
    %c7 = arith.constant 7 : index
    %c0_58 = arith.constant 0 : index
    %155 = vector.load %arg7[%c7, %c0_58] : memref<9x32xf32, #tpu.memory_space<vmem>>, vector<1x32xf32>
    %c8 = arith.constant 8 : index
    %c0_59 = arith.constant 0 : index
    %156 = vector.load %arg7[%c8, %c0_59] : memref<9x32xf32, #tpu.memory_space<vmem>>, vector<1x32xf32>
    %cst_60 = arith.constant dense<0.000000e+00> : vector<16xf32>
    %157 = vector.multi_reduction <add>, %154, %cst_60 [1] : vector<16x32xf32> to vector<16xf32>
    %158 = vector.shape_cast %157 : vector<16xf32> to vector<16x1xf32>
    %cst_61 = arith.constant 3.200000e+01 : f32
    %159 = vector.broadcast %cst_61 : f32 to vector<16x1xf32>
    %160 = arith.divf %158, %159 : vector<16x1xf32>
    %161 = vector.broadcast %160 : vector<16x1xf32> to vector<16x32xf32>
    %162 = arith.subf %154, %161 : vector<16x32xf32>
    %163 = arith.mulf %162, %162 : vector<16x32xf32>
    %cst_62 = arith.constant dense<0.000000e+00> : vector<16xf32>
    %164 = vector.multi_reduction <add>, %163, %cst_62 [1] : vector<16x32xf32> to vector<16xf32>
    %165 = vector.shape_cast %164 : vector<16xf32> to vector<16x1xf32>
    %cst_63 = arith.constant 3.200000e+01 : f32
    %166 = vector.broadcast %cst_63 : f32 to vector<16x1xf32>
    %167 = arith.divf %165, %166 : vector<16x1xf32>
    %168 = vector.broadcast %160 : vector<16x1xf32> to vector<16x32xf32>
    %169 = arith.subf %154, %168 : vector<16x32xf32>
    %cst_64 = arith.constant 9.99999974E-6 : f32
    %170 = vector.broadcast %cst_64 : f32 to vector<16x1xf32>
    %171 = arith.addf %167, %170 : vector<16x1xf32>
    %172 = math.rsqrt %171 : vector<16x1xf32>
    %173 = vector.broadcast %172 : vector<16x1xf32> to vector<16x32xf32>
    %174 = arith.mulf %169, %173 : vector<16x32xf32>
    %175 = vector.broadcast %155 : vector<1x32xf32> to vector<16x32xf32>
    %176 = arith.mulf %174, %175 : vector<16x32xf32>
    %177 = vector.broadcast %156 : vector<1x32xf32> to vector<16x32xf32>
    %178 = arith.addf %176, %177 : vector<16x32xf32>
    %179 = vector.shape_cast %178 : vector<16x32xf32> to vector<2x8x32xf32>
    %180 = vector.extract_strided_slice %179 {offsets = [0, 0, 0], sizes = [1, 8, 32], strides = [1, 1, 1]} : vector<2x8x32xf32> to vector<1x8x32xf32>
    %181 = vector.shape_cast %180 : vector<1x8x32xf32> to vector<8x32xf32>
    %182 = tpu.transpose %181, [1, 0] : vector<8x32xf32> -> vector<32x8xf32>
    %c0_65 = arith.constant 0 : index
    %c0_66 = arith.constant 0 : index
    %c0_67 = arith.constant 0 : index
    %183 = vector.load %arg8[%c0_65, %c0_66, %c0_67] : memref<2x32x8xf32, #tpu.memory_space<vmem>>, vector<1x32x8xf32>
    %184 = vector.shape_cast %183 : vector<1x32x8xf32> to vector<32x8xf32>
    %185 = vector.shape_cast %182 : vector<32x8xf32> to vector<1x32x8xf32>
    tpu.vector_store %arg8[%c0_65, %c0_66, %c0_67], %185 {strides = array<i32>} : memref<2x32x8xf32, #tpu.memory_space<vmem>>, vector<1x32x8xf32>,
    %186 = vector.extract_strided_slice %179 {offsets = [1, 0, 0], sizes = [1, 8, 32], strides = [1, 1, 1]} : vector<2x8x32xf32> to vector<1x8x32xf32>
    %187 = vector.shape_cast %186 : vector<1x8x32xf32> to vector<8x32xf32>
    %188 = tpu.transpose %187, [1, 0] : vector<8x32xf32> -> vector<32x8xf32>
    %c1_68 = arith.constant 1 : index
    %c0_69 = arith.constant 0 : index
    %c0_70 = arith.constant 0 : index
    %189 = vector.load %arg8[%c1_68, %c0_69, %c0_70] : memref<2x32x8xf32, #tpu.memory_space<vmem>>, vector<1x32x8xf32>
    %190 = vector.shape_cast %189 : vector<1x32x8xf32> to vector<32x8xf32>
    %191 = vector.shape_cast %188 : vector<32x8xf32> to vector<1x32x8xf32>
    tpu.vector_store %arg8[%c1_68, %c0_69, %c0_70], %191 {strides = array<i32>} : memref<2x32x8xf32, #tpu.memory_space<vmem>>, vector<1x32x8xf32>,
    return
  }
}

</mosaic_0001>

<bundles_post_ra>
// kernel: transformer_decoder_layer.1
= control target key start
LH: loop header
LB: loop body
LE: loop exit
PB: predicated region body
PF: predicated region fallthrough
CT: control target
= control target key end

     0   :  { %v4157_v2 = vmov 0.0   ;;  %vm183_vm0 = vcmask 261120   ;;  %s4158_s24 = smov 64   ;;  %s4159_s25 = smov 96   ;;  %vm4161_vm1 = vmmov 0   ;;  %vm1026_vm2 = vcmask 64512   ;;  %s4798_s0 = inlined_call_operand.vmem [shape: f32[2,32,8], index: 0, kind: input, shape index: {}]   ;;  %s4799_s2 = inlined_call_operand.vmem [shape: f32[32,512], index: 2, kind: input, shape index: {}]   ;;  %s4800_s3 = inlined_call_operand.vmem [shape: f32[2,128], index: 3, kind: input, shape index: {}]   ;;  %s4801_s1 = inlined_call_operand.vmem [shape: f32[2,32,16], index: 1, kind: input, shape index: {}]   ;;  %s4802_s7 = inlined_call_operand.vmem [shape: f32[9,32], index: 7, kind: input, shape index: {}]   ;;  %s4803_s4 = inlined_call_operand.vmem [shape: f32[32,64], index: 4, kind: input, shape index: {}]   ;;  %s4804_s6 = inlined_call_operand.vmem [shape: f32[64,32], index: 6, kind: input, shape index: {}]   ;;  %s4805_s5 = inlined_call_operand.vmem [shape: f32[1,64], index: 5, kind: input, shape index: {}]   ;;  %s4806_s8 = inlined_call_operand.vmem [shape: f32[2,32,8], index: 8, kind: output, shape index: {}]  }
   0x1   :  { %v29_v0 = vld [vmem:[%s4798_s0] sm:$0xff]  ;;  %254 = vmatprep.mubr.f32.mxu0 %v4157_v2  ;;  %v30_v3 = vld [vmem:[%s4798_s0 + $0x8] sm:$0xff]  ;;  %v31_v16 = vld [vmem:[%s4798_s0 + $0x10] sm:$0xff]  ;;  %s4160_s26 = smov 32   ;;  %vm2443_vm4 = vcmask 130048   ;;  %vm3280_vm5 = vcmask 523264  }
   0x2   :  { %v3488_v1 = vld [vmem:[%s4798_s0 + $0x20] sm:$0xff]  ;;  %33 = vxpose.xlu0.b32.start [1/4] (short) (narrow) %v29_v0, 8  ;;  %v3489_v4 = vld [vmem:[%s4798_s0 + $0x28] sm:$0xff]  ;;  %v3490_v17 = vld [vmem:[%s4798_s0 + $0x30] sm:$0xff] }
   0x3   :  { %70 = vxpose.xlu1.b32.start [1/4] (short) (narrow) %v3488_v1, 8  ;;  %v176_v5 = vld [vmem:[%s4799_s2 + $0x8] sm:$0xff]  ;;  %v175_v7 = vld [vmem:[%s4799_s2] sm:$0xff]  ;;  %v32_v19 = vld [vmem:[%s4798_s0 + $0x18] sm:$0xff] }
   0x4   :  { %v178_v6 = vld [vmem:[%s4799_s2 + $0x28] sm:$0xff]  ;;  %v177_v8 = vld [vmem:[%s4799_s2 + $0x20] sm:$0xff]  ;;  %v3491_v20 = vld [vmem:[%s4798_s0 + $0x38] sm:$0xff] }
   0x5   :  { %v3937_v9 = vpack.c.bf16 %v178_v6, %v176_v5  ;;  %v3939_v10 = vpack.c.bf16 %v177_v8, %v175_v7  ;;  %v180_v11 = vld [vmem:[%s4799_s2 + $0x48] sm:$0xff]  ;;  %v179_v13 = vld [vmem:[%s4799_s2 + $0x40] sm:$0xff]  ;;  %v274_v27 = vld [vmem:[%s4799_s2 + $0x18] sm:$0xff] }
   0x6   :  { %v182_v12 = vld [vmem:[%s4799_s2 + $0x68] sm:$0xff]  ;;  %34 = vxpose.xlu0.b32.cont [2/4] (short) (narrow) %v30_v3, 8  ;;  %v181_v15 = vld [vmem:[%s4799_s2 + $0x60] sm:$0xff]  ;;  %v275_v28 = vld [vmem:[%s4799_s2 + $0x38] sm:$0xff] }
   0x7   :  { %71 = vxpose.xlu1.b32.cont [2/4] (short) (narrow) %v3489_v4, 8  ;;  %v3941_v14 = vpack.c.bf16 %v182_v12, %v180_v11  ;;  %3938 = vmatprep.subr.bf16.mxu0 %v3937_v9  ;;  %v3943_v18 = vpack.c.bf16 %v181_v15, %v179_v13  ;;  %v3498_v23 = vld [vmem:[%s4800_s3] ss:$0 sm:$0xff]  ;;  %v276_v29 = vld [vmem:[%s4799_s2 + $0x58] sm:$0xff]  ;;  %v3945_v30 = vpack.c.bf16 %v275_v28, %v274_v27  ;;  %v3493_v37 = vld [vmem:[%s4801_s1 + $0x28] sm:$0xff] }
   0x8   :  { %3940 = vmatpush1.bf16.msra.mxu0 %v3939_v10  ;;  %v277_v31 = vld [vmem:[%s4799_s2 + $0x78] sm:$0xff]  ;;  %v3492_v36 = vld [vmem:[%s4801_s1 + $0x20] sm:$0xff]  ;;  %v3494_v38 = vld [vmem:[%s4801_s1 + $0x30] sm:$0xff] }
   0x9   :  { %3942 = vmatprep.subr.bf16.mxu0 %v3941_v14  ;;  %v3949_v32 = vpack.c.bf16 %v277_v31, %v276_v29  ;;  %4041 = vmatprep.subr.bf16.mxu1 %v3945_v30  ;;  %v3495_v39 = vld [vmem:[%s4801_s1 + $0x38] sm:$0xff]  ;;  %v102_v40 = vld [vmem:[%s4801_s1] sm:$0xff]  ;;  %v103_v41 = vld [vmem:[%s4801_s1 + $0x8] sm:$0xff] }
   0xa   :  { %35 = vxpose.xlu0.b32.cont [3/4] (short) (narrow) %v31_v16, 8  ;;  %4043 = vmatpush3.bf16.msra.mxu1 %v3945_v30  ;;  %v104_v42 = vld [vmem:[%s4801_s1 + $0x10] sm:$0xff]  ;;  %v105_v43 = vld [vmem:[%s4801_s1 + $0x18] sm:$0xff]  ;;  %vm4473_vm3 = vmpackc.low %vm183_vm0, %vm183_vm0 }
   0xb   :  { %72 = vxpose.xlu1.b32.cont [3/4] (short) (narrow) %v3490_v17, 8  ;;  %4042 = vmatprep.subr.bf16.mxu1 %v3949_v32 }
   0xc   :  { %3944 = vmatpush1.bf16.msra.mxu0 %v3943_v18 }
   0xd   :  { %3946 = vmatprep.subr.bf16.mxu0 %v3945_v30 }
   0xe   :  { %36 = vxpose.xlu0.b32.end [4/4] (short) (narrow) %v32_v19, 8  ;;  %4044 = vmatpush3.bf16.msra.mxu1 %v3949_v32 }
   0xf   :  { %73 = vxpose.xlu1.b32.end [4/4] (short) (narrow) %v3491_v20, 8  ;;  %3709 = vmatprep.subr.mxu1 %v4157_v2 }
  0x82   :  { %v4257_v21 = vpop.trf.xlu0 }
  0x83   :  { %3496 = vmatmul.mubr.msk.f32.vlgmr.msra.gmra.mrb[0].mxu0 %vm183_vm0, %v4257_v21  ;;  %v4261_v22 = vpop.trf.xlu1 }
  0x84   :  { %260 = vmatprep.mubr.f32.mxu0 %v4157_v2  ;;  %3948 = vmatpush3.bf16.msra.mxu0 %v3945_v30 }
  0x85   :  { %3950 = vmatprep.subr.bf16.mxu0 %v3949_v32 }
  0x87   :  { %3497 = vmatmul.mubr.msk.f32.gmra.mrb[2].mxu0 %vm183_vm0, %v4261_v22 }
  0x88   :  { %3952 = vmatpush3.bf16.msra.mxu0 %v3949_v32 }
  0x89   :  { %3704 = vmatprep.subr.mxu0 %v4157_v2 }
 0x156   :  { %v256_v24 = vpop.f32.mrb[0].mxu0 }
 0x157   :  { %v4269_v25 = vadd.f32 %v3498_v23, %v256_v24  ;;  %v4271_v26 = vpop.f32.mrb[1].mxu0 }
 0x159   :  { %442 = vrot.lane.b32.xlu1 %v4269_v25, %s4158_s24  ;;  %438 = vrot.lane.b32.xlu0 %v4269_v25, %s4159_s25 }
 0x15a   :  { %v262_v33 = vpop.f32.mrb[2].mxu0 }
 0x15b   :  { %v273_v34 = vadd.f32 %v3498_v23, %v262_v33  ;;  %v4289_v35 = vpop.f32.mrb[3].mxu0 }
 0x15d   :  { %446 = vrot.lane.b32.xlu1 %v4269_v25, %s4160_s26  ;;  %448 = vrot.lane.b32.xlu0 %v273_v34, %s4160_s26 }
 0x161   :  { %440 = vrot.lane.b32.xlu1 %v273_v34, %s4159_s25 }
 0x165   :  { %444 = vrot.lane.b32.xlu1 %v273_v34, %s4158_s24 }
 0x17b   :  { %143 = vxpose.xlu0.b32.start [1/4] (short) (narrow) %v3492_v36, 16 }
 0x17f   :  { %144 = vxpose.xlu0.b32.cont [2/4] (short) (narrow) %v3493_v37, 16 }
 0x183   :  { %145 = vxpose.xlu0.b32.cont [3/4] (short) (narrow) %v3494_v38, 16 }
 0x187   :  { %146 = vxpose.xlu0.b32.end [4/4] (short) (narrow) %v3495_v39, 16 }
 0x18e   :  { %106 = vxpose.xlu1.b32.start [1/4] (short) (narrow) %v102_v40, 16 }
 0x192   :  { %107 = vxpose.xlu1.b32.cont [2/4] (short) (narrow) %v103_v41, 16 }
 0x196   :  { %108 = vxpose.xlu1.b32.cont [3/4] (short) (narrow) %v104_v42, 16 }
 0x19a   :  { %109 = vxpose.xlu1.b32.end [4/4] (short) (narrow) %v105_v43, 16 }
 0x1cb   :  { %v439_v44 = vpop.permute.xlu0 %438  ;;  %v443_v46 = vpop.permute.xlu1 %442 }
 0x1cf   :  { %v449_v45 = vpop.permute.xlu0 %448  ;;  %v447_v48 = vpop.permute.xlu1 %446 }
 0x1d3   :  { %v441_v50 = vpop.permute.xlu1 %440 }
 0x1d7   :  { %v445_v51 = vpop.permute.xlu1 %444 }
 0x1fb   :  { %v4322_v47 = vpop.trf.xlu0 }
 0x1fc   :  { %3701 = vmatprep.mubr.msk.f32.mxu1 %vm183_vm0, %v4322_v47 }
 0x1ff   :  { %v4326_v49 = vpop.trf.xlu0 }
 0x200   :  { %3702 = vmatmul.mubr.msk.f32.vlgmr.msra.gmra.mrb[0].mxu1 %vm183_vm0, %v4326_v49 }
 0x201   :  { %3710 = vmatpush3.xpose.msk.msra.mxu1 %vm183_vm0, %v4261_v22  ;;  %3711 = vmatprep.mubr.msk.f32.mxu1 %vm4161_vm1, %v4157_v2 }
 0x202   :  { %3719 = vmatprep.subr.mxu1 %v4157_v2 }
 0x204   :  { %3712 = vmatmul.mubr.msk.f32.vlgmr.msra.gmra.mrb[2].mxu1 %vm183_vm0, %v273_v34 }
 0x205   :  { %3720 = vmatpush3.xpose.msk.msra.mxu1 %vm183_vm0, %v4261_v22  ;;  %3721 = vmatprep.mubr.msk.f32.mxu1 %vm4161_vm1, %v4157_v2 }
 0x206   :  { %3729 = vmatprep.subr.mxu1 %v4157_v2 }
 0x208   :  { %3722 = vmatmul.mubr.msk.f32.vlgmr.msra.gmra.mrb[4].mxu1 %vm183_vm0, %v441_v50 }
 0x209   :  { %3730 = vmatpush3.xpose.msk.msra.mxu1 %vm183_vm0, %v4261_v22  ;;  %3731 = vmatprep.mubr.msk.f32.mxu1 %vm4161_vm1, %v4157_v2 }
 0x20a   :  { %3739 = vmatprep.subr.mxu1 %v4157_v2 }
 0x20c   :  { %3732 = vmatmul.mubr.msk.f32.vlgmr.msra.gmra.mrb[6].mxu1 %vm183_vm0, %v445_v51 }
 0x20d   :  { %3740 = vmatpush3.xpose.msk.msra.mxu1 %vm183_vm0, %v4261_v22  ;;  %3741 = vmatprep.mubr.msk.f32.mxu1 %vm4161_vm1, %v4157_v2 }
 0x20e   :  { %v4352_v52 = vpop.trf.xlu1  ;;  %3749 = vmatprep.subr.mxu1 %v4157_v2 }
 0x20f   :  { %3698 = vmatprep.mubr.msk.f32.mxu0 %vm183_vm0, %v4352_v52 }
 0x210   :  { %3742 = vmatmul.mubr.msk.f32.vlgmr.msra.gmra.mrb[8].mxu1 %vm183_vm0, %v449_v45 }
 0x211   :  { %3750 = vmatpush3.msra.mxu1 %v4289_v35  ;;  %3751 = vmatprep.mubr.msk.f32.mxu1 %vm4161_vm1, %v4157_v2 }
 0x212   :  { %v4361_v53 = vpop.trf.xlu1  ;;  %3759 = vmatprep.subr.mxu1 %v4157_v2 }
 0x213   :  { %3699 = vmatmul.mubr.msk.f32.vlgmr.msra.gmra.mrb[4].mxu0 %vm183_vm0, %v4361_v53 }
 0x214   :  { %3705 = vmatpush3.xpose.msk.msra.mxu0 %vm183_vm0, %v4257_v21  ;;  %3706 = vmatprep.mubr.msk.f32.mxu0 %vm4161_vm1, %v4157_v2 }
 0x215   :  { %3714 = vmatprep.subr.mxu0 %v4157_v2 }
 0x217   :  { %3707 = vmatmul.mubr.msk.f32.vlgmr.msra.gmra.mrb[6].mxu0 %vm183_vm0, %v4269_v25 }
 0x218   :  { %3715 = vmatpush3.xpose.msk.msra.mxu0 %vm183_vm0, %v4257_v21  ;;  %3716 = vmatprep.mubr.msk.f32.mxu0 %vm4161_vm1, %v4157_v2 }
 0x219   :  { %3724 = vmatprep.subr.mxu0 %v4157_v2 }
 0x21b   :  { %3717 = vmatmul.mubr.msk.f32.vlgmr.msra.gmra.mrb[8].mxu0 %vm183_vm0, %v439_v44 }
 0x21c   :  { %3725 = vmatpush3.xpose.msk.msra.mxu0 %vm183_vm0, %v4257_v21  ;;  %3726 = vmatprep.mubr.msk.f32.mxu0 %vm4161_vm1, %v4157_v2 }
 0x21d   :  { %3734 = vmatprep.subr.mxu0 %v4157_v2 }
 0x21f   :  { %3727 = vmatmul.mubr.msk.f32.vlgmr.msra.gmra.mrb[10].mxu0 %vm183_vm0, %v443_v46 }
 0x220   :  { %3735 = vmatpush3.xpose.msk.msra.mxu0 %vm183_vm0, %v4257_v21  ;;  %3736 = vmatprep.mubr.msk.f32.mxu0 %vm4161_vm1, %v4157_v2 }
 0x221   :  { %3744 = vmatprep.subr.mxu0 %v4157_v2 }
 0x223   :  { %3737 = vmatmul.mubr.msk.f32.vlgmr.msra.gmra.mrb[12].mxu0 %vm183_vm0, %v447_v48 }
 0x224   :  { %3745 = vmatpush3.msra.mxu0 %v4271_v26  ;;  %3746 = vmatprep.mubr.msk.f32.mxu0 %vm4161_vm1, %v4157_v2 }
 0x225   :  { %3754 = vmatprep.subr.mxu0 %v4157_v2 }
 0x2d3   :  { %v4395_v54 = vpop.f32.mrb[0].mxu1 }
 0x2d4   :  { %v4397_v55 = vpop.f32.mrb[1].mxu1 }
 0x2d5   :  { %v3997_v56 = vpack.c.bf16 %v4395_v54, %v4397_v55  ;;  %v4403_v57 = vpack.i.bf16 %v4395_v54, %v4397_v55 }
 0x2d7   :  { %v590_v58 = vpop.f32.mrb[2].mxu1 }
 0x2d8   :  { %v3713_v59 = vpop.f32.mrb[3].mxu1  ;;  %v1030_v60 = vsel %vm1026_vm2, %v590_v58, -inf }
 0x2d9   :  { %1031 = vmax.xlane.f32.xlu1 %v1030_v60 }
 0x2db   :  { %v734_v61 = vpop.f32.mrb[4].mxu1 }
 0x2dc   :  { %v3723_v62 = vpop.f32.mrb[5].mxu1  ;;  %v1036_v63 = vsel %vm1026_vm2, %v734_v61, -inf }
 0x2dd   :  { %1037 = vmax.xlane.f32.xlu1 %v1036_v63 }
 0x2df   :  { %v878_v0 = vpop.f32.mrb[6].mxu1 }
 0x2e0   :  { %v3733_v1 = vpop.f32.mrb[7].mxu1  ;;  %v1042_v3 = vsel %vm1026_vm2, %v878_v0, -inf }
 0x2e1   :  { %1043 = vmax.xlane.f32.xlu1 %v1042_v3 }
 0x2e3   :  { %v1022_v4 = vpop.f32.mrb[8].mxu1 }
 0x2e4   :  { %v3743_v5 = vpop.f32.mrb[9].mxu1  ;;  %v1048_v6 = vsel %vm1026_vm2, %v1022_v4, -inf }
 0x2e5   :  { %1049 = vmax.xlane.f32.xlu1 %v1048_v6 }
 0x2e6   :  { %v4409_v7 = vpop.f32.mrb[4].mxu0 }
 0x2e7   :  { %v4411_v8 = vpop.f32.mrb[5].mxu0 }
 0x2e8   :  { %v3994_v9 = vpack.c.bf16 %v4409_v7, %v4411_v8  ;;  %v4417_v10 = vpack.i.bf16 %v4409_v7, %v4411_v8 }
 0x2ea   :  { %v518_v11 = vpop.f32.mrb[6].mxu0 }
 0x2eb   :  { %v3708_v12 = vpop.f32.mrb[7].mxu0  ;;  %v1027_v13 = vsel %vm1026_vm2, %v518_v11, -inf }
 0x2ec   :  { %1028 = vmax.xlane.f32.xlu0 %v1027_v13 }
 0x2ee   :  { %v662_v14 = vpop.f32.mrb[8].mxu0 }
 0x2ef   :  { %v3718_v15 = vpop.f32.mrb[9].mxu0  ;;  %v1033_v16 = vsel %vm1026_vm2, %v662_v14, -inf }
 0x2f0   :  { %1034 = vmax.xlane.f32.xlu0 %v1033_v16 }
 0x2f2   :  { %v806_v17 = vpop.f32.mrb[10].mxu0 }
 0x2f3   :  { %v3728_v18 = vpop.f32.mrb[11].mxu0  ;;  %v1039_v19 = vsel %vm1026_vm2, %v806_v17, -inf }
 0x2f4   :  { %1040 = vmax.xlane.f32.xlu0 %v1039_v19 }
 0x2f6   :  { %379 = vrot.lane.b32.xlu1 %v4289_v35, %s4159_s25  ;;  %v950_v20 = vpop.f32.mrb[12].mxu0 }
 0x2f7   :  { %v3738_v23 = vpop.f32.mrb[13].mxu0  ;;  %v1045_v24 = vsel %vm1026_vm2, %v950_v20, -inf }
 0x2f8   :  { %1046 = vmax.xlane.f32.xlu0 %v1045_v24 }
 0x2fa   :  { %383 = vrot.lane.b32.xlu1 %v4271_v26, %s4158_s24 }
 0x30e   :  { %377 = vrot.lane.b32.xlu0 %v4271_v26, %s4159_s25 }
 0x312   :  { %385 = vrot.lane.b32.xlu0 %v4289_v35, %s4158_s24 }
 0x366   :  { %v1032_v25 = vpop.xlane.xlu1 %1031 }
 0x367   :  { %v1052_v27 = vsub.f32 %v590_v58, %v1032_v25 }
 0x369   :  { %v1061_v28 = vmul.f32 1.442695, %v1052_v27 }
 0x36a   :  { %v1038_v29 = vpop.xlane.xlu1 %1037 }
 0x36b   :  { %4081 = vpow2.f32 %v1061_v28  ;;  %v1054_v30 = vsub.f32 %v734_v61, %v1038_v29 }
 0x36d   :  { %v1065_v31 = vmul.f32 1.442695, %v1054_v30 }
 0x36e   :  { %v1044_v32 = vpop.xlane.xlu1 %1043 }
 0x36f   :  { %4083 = vpow2.f32 %v1065_v31  ;;  %v1056_v33 = vsub.f32 %v878_v0, %v1044_v32 }
 0x371   :  { %v1069_v34 = vmul.f32 1.442695, %v1056_v33 }
 0x372   :  { %v1050_v36 = vpop.xlane.xlu1 %1049 }
 0x373   :  { %4085 = vpow2.f32 %v1069_v34  ;;  %v1058_v37 = vsub.f32 %v1022_v4, %v1050_v36 }
 0x375   :  { %v4082_v38 = vpop.eup %4081  ;;  %v1073_v39 = vmul.f32 1.442695, %v1058_v37 }
 0x376   :  { %v1078_v40 = vsel %vm1026_vm2, %v4082_v38, 0.0  ;;  %v380_v16 = vpop.permute.xlu1 %379 }
 0x377   :  { %4087 = vpow2.f32 %v1073_v39  ;;  %1079 = vadd.xlane.f32.xlu1 %v1078_v40 }
 0x379   :  { %v4084_v41 = vpop.eup %4083  ;;  %v1029_v42 = vpop.xlane.xlu0 %1028 }
 0x37a   :  { %v1051_v43 = vsub.f32 %v518_v11, %v1029_v42  ;;  %v1084_v44 = vsel %vm1026_vm2, %v4084_v41, 0.0 }
 0x37b   :  { %1085 = vadd.xlane.f32.xlu1 %v1084_v44 }
 0x37c   :  { %v1059_v45 = vmul.f32 1.442695, %v1051_v43 }
 0x37d   :  { %v4086_v46 = vpop.eup %4085  ;;  %v1035_v48 = vpop.xlane.xlu0 %1034 }
 0x37e   :  { %4089 = vpow2.f32 %v1059_v45  ;;  %v1053_v50 = vsub.f32 %v662_v14, %v1035_v48  ;;  %v1090_v51 = vsel %vm1026_vm2, %v4086_v46, 0.0  ;;  %v4162_v45 = vmov 0.0|0.0  }
 0x37f   :  { %1091 = vadd.xlane.f32.xlu1 %v1090_v51  ;;  %v4481_v48 = vpack.c.bf16 %v4361_v53, %v4352_v52 }
 0x380   :  { %v1063_v58 = vmul.f32 1.442695, %v1053_v50 }
 0x381   :  { %v4434_v59 = vpop.eup %4087  ;;  %v1041_v60 = vpop.xlane.xlu0 %1040 }
 0x382   :  { %4091 = vpow2.f32 %v1063_v58  ;;  %v1055_v61 = vsub.f32 %v806_v17, %v1041_v60  ;;  %v1096_v62 = vsel %vm1026_vm2, %v4434_v59, 0.0  ;;  %v384_v17 = vpop.permute.xlu1 %383 }
 0x383   :  { %1097 = vadd.xlane.f32.xlu1 %v1096_v62 }
 0x384   :  { %v1067_v63 = vmul.f32 1.442695, %v1055_v61 }
 0x385   :  { %v1047_v0 = vpop.xlane.xlu0 %1046 }
 0x386   :  { %4093 = vpow2.f32 %v1067_v63  ;;  %v1057_v1 = vsub.f32 %v950_v20, %v1047_v0 }
 0x388   :  { %v4090_v3 = vpop.eup %4089  ;;  %v1071_v4 = vmul.f32 1.442695, %v1057_v1 }
 0x389   :  { %v1075_v5 = vsel %vm1026_vm2, %v4090_v3, 0.0  ;;  %v378_v23 = vpop.permute.xlu0 %377 }
 0x38a   :  { %4095 = vpow2.f32 %v1071_v4  ;;  %1076 = vadd.xlane.f32.xlu0 %v1075_v5 }
 0x38c   :  { %v4092_v6 = vpop.eup %4091 }
 0x38d   :  { %v1081_v11 = vsel %vm1026_vm2, %v4092_v6, 0.0  ;;  %v386_v27 = vpop.permute.xlu0 %385 }
 0x38e   :  { %1082 = vadd.xlane.f32.xlu0 %v1081_v11 }
 0x390   :  { %v4094_v12 = vpop.eup %4093 }
 0x391   :  { %v1087_v13 = vsel %vm1026_vm2, %v4094_v12, 0.0 }
 0x392   :  { %1088 = vadd.xlane.f32.xlu0 %v1087_v13 }
 0x394   :  { %v4441_v14 = vpop.eup %4095  ;;  %389 = vrot.lane.b32.xlu1 %v4271_v26, %s4160_s26 }
 0x395   :  { %v1093_v15 = vsel %vm1026_vm2, %v4441_v14, 0.0 }
 0x396   :  { %1094 = vadd.xlane.f32.xlu0 %v1093_v15 }
 0x3ac   :  { %391 = vrot.lane.b32.xlu0 %v4289_v35, %s4160_s26 }
 0x404   :  { %v1080_v18 = vpop.xlane.xlu1 %1079 }
 0x405   :  { %4097 = vrcp.f32 %v1080_v18 }
 0x408   :  { %v1086_v19 = vpop.xlane.xlu1 %1085 }
 0x409   :  { %4099 = vrcp.f32 %v1086_v19 }
 0x40c   :  { %v1092_v20 = vpop.xlane.xlu1 %1091 }
 0x40d   :  { %4101 = vrcp.f32 %v1092_v20 }
 0x40f   :  { %v4098_v24 = vpop.eup %4097 }
 0x410   :  { %v1108_v25 = vmul.f32 %v4098_v24, %v4082_v38  ;;  %v1098_v29 = vpop.xlane.xlu1 %1097 }
 0x412   :  { %3752 = vmatmul.mubr.msk.f32.vlgmr.msra.gmra.mrb[10].mxu1 %vm1026_vm2, %v1108_v25 }
 0x413   :  { %v4100_v26 = vpop.eup %4099  ;;  %3760 = vmatpush3.msra.mxu1 %v380_v16  ;;  %3761 = vmatprep.mubr.msk.f32.mxu1 %vm4161_vm1, %v4157_v2 }
 0x414   :  { %v1110_v35 = vmul.f32 %v4100_v26, %v4084_v41  ;;  %3769 = vmatprep.subr.mxu1 %v4157_v2  ;;  %v390_v50 = vpop.permute.xlu1 %389 }
 0x416   :  { %3762 = vmatmul.mubr.msk.f32.vlgmr.msra.gmra.mrb[12].mxu1 %vm1026_vm2, %v1110_v35 }
 0x417   :  { %v4102_v28 = vpop.eup %4101  ;;  %3770 = vmatpush3.msra.mxu1 %v386_v27  ;;  %v1077_v30 = vpop.xlane.xlu0 %1076  ;;  %3771 = vmatprep.mubr.msk.f32.mxu1 %vm4161_vm1, %v4157_v2 }
 0x418   :  { %v1112_v31 = vmul.f32 %v4102_v28, %v4086_v46  ;;  %4103 = vrcp.f32 %v1077_v30  ;;  %3779 = vmatprep.subr.mxu1 %v4157_v2 }
 0x419   :  { %4105 = vrcp.f32 %v1098_v29 }
 0x41a   :  { %3772 = vmatmul.mubr.msk.f32.vlgmr.msra.gmra.mrb[14].mxu1 %vm1026_vm2, %v1112_v31 }
 0x41b   :  { %v1083_v32 = vpop.xlane.xlu0 %1082  ;;  %3781 = vmatprep.mubr.msk.f32.mxu1 %vm4161_vm1, %v4157_v2 }
 0x41c   :  { %4107 = vrcp.f32 %v1083_v32 }
 0x41f   :  { %v1089_v33 = vpop.xlane.xlu0 %1088 }
 0x420   :  { %4109 = vrcp.f32 %v1089_v33 }
 0x422   :  { %v4104_v34 = vpop.eup %4103 }
 0x423   :  { %v1107_v36 = vmul.f32 %v4104_v34, %v4090_v3  ;;  %v1095_v37 = vpop.xlane.xlu0 %1094  ;;  %v4106_v38 = vpop.eup %4105 }
 0x424   :  { %4111 = vrcp.f32 %v1095_v37  ;;  %v1114_v40 = vmul.f32 %v4106_v38, %v4434_v59 }
 0x425   :  { %3747 = vmatmul.mubr.msk.f32.vlgmr.msra.gmra.mrb[14].mxu0 %vm1026_vm2, %v1107_v36 }
 0x426   :  { %v4108_v39 = vpop.eup %4107  ;;  %3755 = vmatpush3.msra.mxu0 %v378_v23  ;;  %3756 = vmatprep.mubr.msk.f32.mxu0 %vm4161_vm1, %v4157_v2 }
 0x427   :  { %v1109_v41 = vmul.f32 %v4108_v39, %v4092_v6  ;;  %v392_v42 = vpop.permute.xlu0 %391  ;;  %3764 = vmatprep.subr.mxu0 %v4157_v2 }
 0x428   :  { %3780 = vmatpush3.msra.mxu1 %v392_v42 }
 0x429   :  { %3757 = vmatmul.mubr.msk.f32.vlgmr.msra.gmra.mrb[16].mxu0 %vm1026_vm2, %v1109_v41  ;;  %3782 = vmatmul.mubr.msk.f32.vlgmr.msra.gmra.mrb[16].mxu1 %vm1026_vm2, %v1114_v40 }
 0x42a   :  { %v4110_v43 = vpop.eup %4109  ;;  %3765 = vmatpush3.msra.mxu0 %v384_v17  ;;  %3766 = vmatprep.mubr.msk.f32.mxu0 %vm4161_vm1, %v4157_v2 }
 0x42b   :  { %v1111_v44 = vmul.f32 %v4110_v43, %v4094_v12  ;;  %3774 = vmatprep.subr.mxu0 %v4157_v2  ;;  %3961 = vmatprep.subr.bf16.mxu1 %v4162_v45  ;;  %v3527_v12 = vld [vmem:[%s4802_s7] ss:$0 sm:$0xff] }
 0x42c   :  { %3799 = vmatprep.mubr.msk.f32.mxu1 %vm4161_vm1, %v4157_v2 }
 0x42d   :  { %3767 = vmatmul.mubr.msk.f32.vlgmr.msra.gmra.mrb[18].mxu0 %vm1026_vm2, %v1111_v44 }
 0x42e   :  { %v4112_v51 = vpop.eup %4111  ;;  %3775 = vmatpush3.msra.mxu0 %v390_v50  ;;  %3776 = vmatprep.mubr.msk.f32.mxu0 %vm4161_vm1, %v4157_v2 }
 0x42f   :  { %v1113_v58 = vmul.f32 %v4112_v51, %v4441_v14  ;;  %3964 = vmatpush3.bf16.xpose.msk.msra.mxu1 %vm4473_vm3, %v4481_v48  ;;  %v1763_v51 = vld [vmem:[%s4799_s2 + $0x30] sm:$0xff] }
 0x430   :  { %3969 = vmatprep.subr.bf16.mxu1 %v4162_v45 }
 0x431   :  { %3777 = vmatmul.mubr.msk.f32.vlgmr.msra.gmra.mrb[20].mxu0 %vm1026_vm2, %v1113_v58 }
 0x4e5   :  { %v1257_v52 = vpop.f32.mrb[10].mxu1 }
 0x4e6   :  { %v3753_v53 = vpop.f32.mrb[11].mxu1  ;;  %v1706_v60 = vsel %vm183_vm0, %v1257_v52, 0.0  ;;  %v1764_v52 = vld [vmem:[%s4799_s2 + $0x50] sm:$0xff] }
 0x4e7   :  { %v1765_v53 = vld [vmem:[%s4799_s2 + $0x70] sm:$0xff] }
 0x4e9   :  { %v1403_v59 = vpop.f32.mrb[12].mxu1 }
 0x4ea   :  { %v1707_v61 = vsel %vm183_vm0, %v1403_v59, 0.0  ;;  %v3763_v62 = vpop.f32.mrb[13].mxu1  ;;  %v3957_v59 = vpack.c.bf16 %v1765_v53, %v1764_v52 }
 0x4eb   :  { %v1708_v63 = vadd.f32 %v1707_v61, %v1706_v60 }
 0x4ed   :  { %v1549_v0 = vpop.f32.mrb[14].mxu1 }
 0x4ee   :  { %v1709_v1 = vsel %vm183_vm0, %v1549_v0, 0.0  ;;  %v3773_v3 = vpop.f32.mrb[15].mxu1 }
 0x4ef   :  { %v1710_v4 = vadd.f32 %v1709_v1, %v1708_v63 }
 0x4f8   :  { %v1184_v5 = vpop.f32.mrb[14].mxu0 }
 0x4f9   :  { %v3748_v6 = vpop.f32.mrb[15].mxu0  ;;  %v1699_v14 = vsel %vm183_vm0, %v1184_v5, 0.0  ;;  %v3528_v5 = vld [vmem:[%s4802_s7 + $0x3] ss:$0 sm:$0xff] }
 0x4fc   :  { %v1330_v11 = vpop.f32.mrb[16].mxu0  ;;  %v1695_v13 = vpop.f32.mrb[16].mxu1 }
 0x4fd   :  { %v1700_v15 = vsel %vm183_vm0, %v1330_v11, 0.0  ;;  %v1711_v16 = vsel %vm183_vm0, %v1695_v13, 0.0  ;;  %v3758_v17 = vpop.f32.mrb[17].mxu0  ;;  %v3783_v18 = vpop.f32.mrb[17].mxu1  ;;  %v3529_v13 = vld [vmem:[%s4802_s7 + $0x4] ss:$0 sm:$0xff] }
 0x4fe   :  { %v1701_v19 = vadd.f32 %v1700_v15, %v1699_v14  ;;  %v1712_v20 = vadd.f32 %v1711_v16, %v1710_v4  ;;  %v3966_v17 = vpack.c.bf16 %v4326_v49, %v4322_v47  ;;  %v3530_v18 = vld [vmem:[%s4800_s3 + $0x1] ss:$0 sm:$0xff] }
 0x500   :  { %v1718_v23 = vadd.f32 %v3527_v12, %v1712_v20  ;;  %v1476_v24 = vpop.f32.mrb[18].mxu0 }
 0x501   :  { %v1702_v25 = vsel %vm183_vm0, %v1476_v24, 0.0  ;;  %v3768_v26 = vpop.f32.mrb[19].mxu0 }
 0x502   :  { %v1703_v27 = vadd.f32 %v1702_v25, %v1701_v19  ;;  %v1720_v35 = vadd.f32 %v1718_v23, %v4261_v22 }
 0x504   :  { %v1622_v28 = vpop.f32.mrb[20].mxu0  ;;  %v1726_v29 = vsel %vm183_vm0, %v1720_v35, 0.0 }
 0x505   :  { %v1704_v30 = vsel %vm183_vm0, %v1622_v28, 0.0  ;;  %1727 = vadd.xlane.f32.xlu0 %v1726_v29  ;;  %v3778_v31 = vpop.f32.mrb[21].mxu0 }
 0x506   :  { %v1705_v32 = vadd.f32 %v1704_v30, %v1703_v27 }
 0x508   :  { %v1717_v33 = vadd.f32 %v3527_v12, %v1705_v32 }
 0x50a   :  { %v1719_v34 = vadd.f32 %v1717_v33, %v4257_v21  ;;  %v1762_v21 = vld [vmem:[%s4799_s2 + $0x10] sm:$0xff] }
 0x50b   :  { %v3953_v58 = vpack.c.bf16 %v1763_v51, %v1762_v21 }
 0x50c   :  { %v1723_v36 = vsel %vm183_vm0, %v1719_v34, 0.0 }
 0x50d   :  { %1724 = vadd.xlane.f32.xlu1 %v1723_v36  ;;  %3954 = vmatprep.subr.bf16.mxu0 %v3953_v58 }
 0x50e   :  { %3956 = vmatpush3.bf16.msra.mxu0 %v3953_v58 }
 0x50f   :  { %3958 = vmatprep.subr.bf16.mxu0 %v3957_v59 }
 0x512   :  { %3960 = vmatpush3.bf16.msra.mxu0 %v3957_v59 }
 0x513   :  { %3965 = vmatprep.subr.bf16.mxu0 %v4162_v45 }
 0x592   :  { %v1728_v37 = vpop.xlane.xlu0 %1727 }
 0x593   :  { %v1731_v38 = vmul.f32 0.03125, %v1728_v37 }
 0x595   :  { %v1733_v39 = vsub.f32 %v1720_v35, %v1731_v38 }
 0x597   :  { %v1735_v40 = vmul.f32 %v1733_v39, %v1733_v39 }
 0x599   :  { %v1739_v22 = vsel %vm183_vm0, %v1735_v40, 0.0 }
 0x59a   :  { %1740 = vadd.xlane.f32.xlu1 %v1739_v22  ;;  %v1725_v41 = vpop.xlane.xlu1 %1724 }
 0x59b   :  { %v1730_v42 = vmul.f32 0.03125, %v1725_v41 }
 0x59d   :  { %v1732_v43 = vsub.f32 %v1719_v34, %v1730_v42 }
 0x59f   :  { %v1734_v44 = vmul.f32 %v1732_v43, %v1732_v43 }
 0x5a1   :  { %v1736_v50 = vsel %vm183_vm0, %v1734_v44, 0.0 }
 0x5a2   :  { %1737 = vadd.xlane.f32.xlu0 %v1736_v50 }
 0x627   :  { %v1741_v60 = vpop.xlane.xlu1 %1740 }
 0x628   :  { %v1743_v61 = vmul.f32 0.03125, %v1741_v60 }
 0x62a   :  { %v1745_v62 = vadd.f32 1e-05, %v1743_v61 }
 0x62c   :  { %4113 = vrsqrt.f32 %v1745_v62 }
 0x62f   :  { %v1738_v63 = vpop.xlane.xlu0 %1737 }
 0x630   :  { %v1742_v0 = vmul.f32 0.03125, %v1738_v63 }
 0x632   :  { %v1744_v1 = vadd.f32 1e-05, %v1742_v0 }
 0x634   :  { %4115 = vrsqrt.f32 %v1744_v1 }
 0x636   :  { %v4114_v3 = vpop.eup %4113 }
 0x637   :  { %v1749_v4 = vmul.f32 %v4114_v3, %v1733_v39 }
 0x639   :  { %v1755_v12 = vmul.f32 %v3528_v5, %v1749_v4 }
 0x63b   :  { %v4530_v16 = vadd.f32 %v3529_v13, %v1755_v12 }
 0x63e   :  { %v4116_v6 = vpop.eup %4115 }
 0x63f   :  { %v1748_v11 = vmul.f32 %v4116_v6, %v1732_v43 }
 0x641   :  { %v1754_v14 = vmul.f32 %v3528_v5, %v1748_v11 }
 0x643   :  { %v4528_v15 = vadd.f32 %v3529_v13, %v1754_v14 }
 0x645   :  { %3792 = vmatprep.mubr.msk.f32.mxu0 %vm183_vm0, %v4528_v15 }
 0x646   :  { %3793 = vmatmul.mubr.msk.f32.vlgmr.msra.gmra.mrb[22].mxu0 %vm183_vm0, %v4530_v16 }
 0x647   :  { %3968 = vmatpush3.bf16.xpose.msk.msra.mxu0 %vm4473_vm3, %v3966_v17  ;;  %3806 = vmatprep.mubr.msk.f32.mxu0 %vm4161_vm1, %v4157_v2 }
 0x648   :  { %3973 = vmatprep.subr.bf16.mxu0 %v4162_v45 }
 0x719   :  { %v3794_v19 = vpop.f32.mrb[22].mxu0 }
 0x71a   :  { %v1849_v47 = vadd.f32 %v3794_v19, %v3530_v18  ;;  %v1843_v49 = vpop.f32.mrb[23].mxu0 }
 0x71b   :  { %v1844_v20 = vadd.f32 %v3530_v18, %v1843_v49 }
 0x71c   :  { %1857 = vrot.lane.b32.xlu1 %v1849_v47, %s4159_s25  ;;  %3807 = vmatmul.mubr.msk.f32.vlgmr.msra.gmra.mrb[24].mxu0 %vm183_vm0, %v1849_v47 }
 0x71d   :  { %3976 = vmatpush3.bf16.xpose.msk.msra.mxu0 %vm4473_vm3, %v3966_v17  ;;  %1855 = vrot.lane.b32.xlu0 %v1844_v20, %s4159_s25 }
 0x71e   :  { %3800 = vmatmul.mubr.msk.f32.vlgmr.msra.gmra.mrb[18].mxu1 %vm183_vm0, %v1844_v20  ;;  %3820 = vmatprep.mubr.msk.f32.mxu0 %vm4161_vm1, %v4157_v2 }
 0x71f   :  { %3972 = vmatpush3.bf16.xpose.msk.msra.mxu1 %vm4473_vm3, %v4481_v48  ;;  %3981 = vmatprep.subr.bf16.mxu0 %v4162_v45 }
 0x720   :  { %1859 = vrot.lane.b32.xlu1 %v1844_v20, %s4158_s24  ;;  %3813 = vmatprep.mubr.msk.f32.mxu1 %vm4161_vm1, %v4157_v2 }
 0x721   :  { %1861 = vrot.lane.b32.xlu0 %v1849_v47, %s4158_s24  ;;  %3977 = vmatprep.subr.bf16.mxu1 %v4162_v45 }
 0x724   :  { %1863 = vrot.lane.b32.xlu1 %v1844_v20, %s4160_s26 }
 0x725   :  { %1865 = vrot.lane.b32.xlu0 %v1849_v47, %s4160_s26 }
 0x78e   :  { %v1858_v23 = vpop.permute.xlu1 %1857 }
 0x78f   :  { %3821 = vmatmul.mubr.msk.f32.vlgmr.msra.gmra.mrb[26].mxu0 %vm183_vm0, %v1858_v23  ;;  %v1856_v24 = vpop.permute.xlu0 %1855 }
 0x790   :  { %3984 = vmatpush3.bf16.xpose.msk.msra.mxu0 %vm4473_vm3, %v3966_v17  ;;  %3814 = vmatmul.mubr.msk.f32.vlgmr.msra.gmra.mrb[20].mxu1 %vm183_vm0, %v1856_v24 }
 0x791   :  { %3980 = vmatpush3.bf16.xpose.msk.msra.mxu1 %vm4473_vm3, %v4481_v48  ;;  %3834 = vmatprep.mubr.msk.f32.mxu0 %vm4161_vm1, %v4157_v2 }
 0x792   :  { %3989 = vmatprep.subr.bf16.mxu0 %v4162_v45  ;;  %3827 = vmatprep.mubr.msk.f32.mxu1 %vm4161_vm1, %v4157_v2  ;;  %v1860_v26 = vpop.permute.xlu1 %1859 }
 0x793   :  { %3985 = vmatprep.subr.bf16.mxu1 %v4162_v45  ;;  %v1862_v25 = vpop.permute.xlu0 %1861 }
 0x796   :  { %v1864_v35 = vpop.permute.xlu1 %1863 }
 0x797   :  { %3835 = vmatmul.mubr.msk.f32.vlgmr.msra.gmra.mrb[28].mxu0 %vm183_vm0, %v1862_v25  ;;  %v1866_v27 = vpop.permute.xlu0 %1865 }
 0x798   :  { %3992 = vmatpush3.bf16.xpose.msk.msra.mxu0 %vm4473_vm3, %v3966_v17  ;;  %3828 = vmatmul.mubr.msk.f32.vlgmr.msra.gmra.mrb[22].mxu1 %vm183_vm0, %v1860_v26 }
 0x799   :  { %3988 = vmatpush3.bf16.xpose.msk.msra.mxu1 %vm4473_vm3, %v4481_v48  ;;  %3848 = vmatprep.mubr.msk.f32.mxu0 %vm4161_vm1, %v4157_v2 }
 0x79a   :  { %3841 = vmatprep.mubr.msk.f32.mxu1 %vm4161_vm1, %v4157_v2  ;;  %3993 = vmatprep.subr.bf16.mxu1 %v4162_v45 }
 0x79b   :  { %3999 = vmatprep.subr.bf16.mxu0 %v4162_v45 }
 0x79f   :  { %3849 = vmatmul.mubr.msk.f32.vlgmr.msra.gmra.mrb[30].mxu0 %vm183_vm0, %v1866_v27 }
 0x7a0   :  { %3842 = vmatmul.mubr.msk.f32.vlgmr.msra.gmra.mrb[24].mxu1 %vm183_vm0, %v1864_v35  ;;  %3869 = vmatprep.mubr.msk.f32.mxu0 %vm4161_vm1, %v4157_v2 }
 0x7a1   :  { %3995 = vmatpush3.bf16.msra.mxu1 %v3994_v9  ;;  %3855 = vmatprep.mubr.msk.f32.mxu1 %vm4161_vm1, %v4157_v2 }
 0x7a2   :  { %3996 = vmatprep.subr.bf16.mxu1 %v4162_v45 }
 0x7ef   :  { %v2007_v46 = vpop.f32.mrb[24].mxu0 }
 0x7f0   :  { %v3808_v48 = vpop.f32.mrb[25].mxu0  ;;  %v2447_v28 = vsel %vm2443_vm4, %v2007_v46, -inf }
 0x7f1   :  { %v1935_v29 = vpop.f32.mrb[18].mxu1  ;;  %2448 = vmax.xlane.f32.xlu0 %v2447_v28 }
 0x7f2   :  { %v3801_v30 = vpop.f32.mrb[19].mxu1  ;;  %v2444_v31 = vsel %vm2443_vm4, %v1935_v29, -inf }
 0x7f3   :  { %2445 = vmax.xlane.f32.xlu1 %v2444_v31 }
 0x862   :  { %v2151_v32 = vpop.f32.mrb[26].mxu0 }
 0x863   :  { %v2079_v33 = vpop.f32.mrb[20].mxu1  ;;  %v3822_v7 = vpop.f32.mrb[27].mxu0  ;;  %v2453_v8 = vsel %vm2443_vm4, %v2151_v32, -inf }
 0x864   :  { %2454 = vmax.xlane.f32.xlu1 %v2453_v8  ;;  %v3815_v9 = vpop.f32.mrb[21].mxu1  ;;  %v2450_v34 = vsel %vm2443_vm4, %v2079_v33, -inf }
 0x865   :  { %2451 = vmax.xlane.f32.xlu0 %v2450_v34 }
 0x86a   :  { %v2295_v36 = vpop.f32.mrb[28].mxu0 }
 0x86b   :  { %v2223_v37 = vpop.f32.mrb[22].mxu1  ;;  %v3836_v38 = vpop.f32.mrb[29].mxu0  ;;  %v2459_v39 = vsel %vm2443_vm4, %v2295_v36, -inf }
 0x86c   :  { %2460 = vmax.xlane.f32.xlu1 %v2459_v39  ;;  %v3829_v40 = vpop.f32.mrb[23].mxu1  ;;  %v2456_v22 = vsel %vm2443_vm4, %v2223_v37, -inf }
 0x86d   :  { %2457 = vmax.xlane.f32.xlu0 %v2456_v22 }
 0x872   :  { %v2439_v41 = vpop.f32.mrb[30].mxu0 }
 0x873   :  { %v2367_v42 = vpop.f32.mrb[24].mxu1  ;;  %v3850_v43 = vpop.f32.mrb[31].mxu0  ;;  %v2465_v44 = vsel %vm2443_vm4, %v2439_v41, -inf }
 0x874   :  { %2466 = vmax.xlane.f32.xlu1 %v2465_v44  ;;  %v3843_v50 = vpop.f32.mrb[25].mxu1  ;;  %v2462_v21 = vsel %vm2443_vm4, %v2367_v42, -inf }
 0x875   :  { %2463 = vmax.xlane.f32.xlu0 %v2462_v21 }
 0x87e   :  { %v2449_v51 = vpop.xlane.xlu0 %2448 }
 0x87f   :  { %v2469_v52 = vsub.f32 %v2007_v46, %v2449_v51 }
 0x880   :  { %v2446_v58 = vpop.xlane.xlu1 %2445 }
 0x881   :  { %v2468_v53 = vsub.f32 %v1935_v29, %v2446_v58  ;;  %v2478_v59 = vmul.f32 1.442695, %v2469_v52 }
 0x883   :  { %v2476_v60 = vmul.f32 1.442695, %v2468_v53  ;;  %4117 = vpow2.f32 %v2478_v59 }
 0x885   :  { %4057 = vrot.lane.b32.xlu1 %v4403_v57, %s4159_s25  ;;  %4119 = vpow2.f32 %v2476_v60 }
 0x889   :  { %4062 = vrot.lane.b32.xlu1 %v4417_v10, %s4158_s24 }
 0x88b   :  { %4052 = vrot.lane.b32.xlu0 %v4417_v10, %s4159_s25 }
 0x88d   :  { %v4617_v61 = vpop.eup %4117 }
 0x88e   :  { %v2495_v63 = vsel %vm2443_vm4, %v4617_v61, 0.0 }
 0x88f   :  { %4067 = vrot.lane.b32.xlu0 %v4403_v57, %s4158_s24  ;;  %v4619_v62 = vpop.eup %4119 }
 0x890   :  { %v2492_v0 = vsel %vm2443_vm4, %v4619_v62, 0.0 }
 0x8ad   :  { %2496 = vadd.xlane.f32.xlu1 %v2495_v63 }
 0x8ae   :  { %2493 = vadd.xlane.f32.xlu0 %v2492_v0 }
 0x8f1   :  { %v2455_v1 = vpop.xlane.xlu1 %2454 }
 0x8f2   :  { %v2471_v3 = vsub.f32 %v2151_v32, %v2455_v1  ;;  %v2452_v4 = vpop.xlane.xlu0 %2451 }
 0x8f3   :  { %v2470_v5 = vsub.f32 %v2079_v33, %v2452_v4 }
 0x8f4   :  { %v2482_v6 = vmul.f32 1.442695, %v2471_v3 }
 0x8f5   :  { %v2480_v11 = vmul.f32 1.442695, %v2470_v5 }
 0x8f6   :  { %4121 = vpow2.f32 %v2482_v6 }
 0x8f7   :  { %4123 = vpow2.f32 %v2480_v11 }
 0x8f9   :  { %v2461_v12 = vpop.xlane.xlu1 %2460 }
 0x8fa   :  { %v2473_v13 = vsub.f32 %v2295_v36, %v2461_v12  ;;  %v2458_v14 = vpop.xlane.xlu0 %2457 }
 0x8fb   :  { %v2472_v17 = vsub.f32 %v2223_v37, %v2458_v14 }
 0x8fc   :  { %v2486_v18 = vmul.f32 1.442695, %v2473_v13 }
 0x8fd   :  { %v2484_v19 = vmul.f32 1.442695, %v2472_v17 }
 0x8fe   :  { %4125 = vpow2.f32 %v2486_v18 }
 0x8ff   :  { %4127 = vpow2.f32 %v2484_v19 }
 0x900   :  { %v4625_v47 = vpop.eup %4121 }
 0x901   :  { %v4627_v49 = vpop.eup %4123  ;;  %v2467_v20 = vpop.xlane.xlu1 %2466  ;;  %v2501_v23 = vsel %vm2443_vm4, %v4625_v47, 0.0 }
 0x902   :  { %v2475_v24 = vsub.f32 %v2439_v41, %v2467_v20  ;;  %v2464_v25 = vpop.xlane.xlu0 %2463  ;;  %2502 = vadd.xlane.f32.xlu1 %v2501_v23  ;;  %v2498_v26 = vsel %vm2443_vm4, %v4627_v49, 0.0 }
 0x903   :  { %v2474_v27 = vsub.f32 %v2367_v42, %v2464_v25  ;;  %2499 = vadd.xlane.f32.xlu0 %v2498_v26 }
 0x904   :  { %v2490_v35 = vmul.f32 1.442695, %v2475_v24 }
 0x905   :  { %v2488_v46 = vmul.f32 1.442695, %v2474_v27  ;;  %v4058_v37 = vpop.permute.xlu1 %4057 }
 0x906   :  { %4129 = vpow2.f32 %v2490_v35  ;;  %v4053_v48 = vpop.permute.xlu0 %4052  ;;  %v4060_v44 = vunpack.i.h.bf16 %v4058_v37  ;;  %v4059_v50 = vunpack.i.l.bf16 %v4058_v37 }
 0x907   :  { %4131 = vpow2.f32 %v2488_v46  ;;  %v4055_v28 = vunpack.i.h.bf16 %v4053_v48  ;;  %v4054_v29 = vunpack.i.l.bf16 %v4053_v48 }
 0x908   :  { %v4633_v30 = vpop.eup %4125 }
 0x909   :  { %v4635_v31 = vpop.eup %4127  ;;  %v4000_v32 = vpack.c.bf16 %v4055_v28, %v4054_v29  ;;  %v2507_v33 = vsel %vm2443_vm4, %v4633_v30, 0.0  ;;  %v4063_v38 = vpop.permute.xlu1 %4062 }
 0x90a   :  { %2508 = vadd.xlane.f32.xlu1 %v2507_v33  ;;  %v2504_v7 = vsel %vm2443_vm4, %v4635_v31, 0.0  ;;  %v4068_v39 = vpop.permute.xlu0 %4067  ;;  %v4065_v52 = vunpack.i.h.bf16 %v4063_v38  ;;  %v4064_v53 = vunpack.i.l.bf16 %v4063_v38 }
 0x90b   :  { %2505 = vadd.xlane.f32.xlu0 %v2504_v7  ;;  %4001 = vmatpush3.bf16.msra.mxu0 %v4000_v32  ;;  %v4069_v51 = vunpack.i.l.bf16 %v4068_v39 }
 0x90c   :  { %4005 = vmatprep.subr.bf16.mxu0 %v4162_v45  ;;  %v4006_v0 = vpack.c.bf16 %v4065_v52, %v4064_v53 }
 0x910   :  { %v4642_v8 = vpop.eup %4129 }
 0x911   :  { %v4644_v9 = vpop.eup %4131  ;;  %v2513_v34 = vsel %vm2443_vm4, %v4642_v8, 0.0 }
 0x912   :  { %2514 = vadd.xlane.f32.xlu1 %v2513_v34  ;;  %v2510_v36 = vsel %vm2443_vm4, %v4644_v9, 0.0 }
 0x913   :  { %2511 = vadd.xlane.f32.xlu0 %v2510_v36 }
 0x923   :  { %4072 = vrot.lane.b32.xlu1 %v4417_v10, %s4160_s26  ;;  %v4003_v10 = vpack.c.bf16 %v4060_v44, %v4059_v50 }
 0x929   :  { %4077 = vrot.lane.b32.xlu0 %v4403_v57, %s4160_s26 }
 0x93a   :  { %v2497_v40 = vpop.xlane.xlu1 %2496 }
 0x93b   :  { %v2494_v22 = vpop.xlane.xlu0 %2493 }
 0x93c   :  { %4133 = vrcp.f32 %v2494_v22 }
 0x93d   :  { %4135 = vrcp.f32 %v2497_v40 }
 0x946   :  { %v4134_v41 = vpop.eup %4133 }
 0x947   :  { %v2524_v42 = vmul.f32 %v4134_v41, %v4619_v62  ;;  %v4136_v43 = vpop.eup %4135  ;;  %v3565_v41 = vld [vmem:[%s4802_s7 + $0x1] ss:$0 sm:$0xff] }
 0x948   :  { %v2525_v57 = vmul.f32 %v4136_v43, %v4617_v61 }
 0x949   :  { %3856 = vmatmul.mubr.msk.f32.vlgmr.msra.gmra.mrb[26].mxu1 %vm2443_vm4, %v2524_v42 }
 0x94a   :  { %3998 = vmatpush3.bf16.msra.mxu1 %v3997_v56  ;;  %3862 = vmatprep.mubr.msk.f32.mxu1 %vm4161_vm1, %v4157_v2  ;;  %v4070_v56 = vunpack.i.h.bf16 %v4068_v39 }
 0x94b   :  { %4002 = vmatprep.subr.bf16.mxu1 %v4162_v45 }
 0x94c   :  { %v4009_v62 = vpack.c.bf16 %v4070_v56, %v4069_v51 }
 0x94d   :  { %3863 = vmatmul.mubr.msk.f32.vlgmr.msra.gmra.mrb[28].mxu1 %vm2443_vm4, %v2525_v57 }
 0x94e   :  { %4004 = vmatpush3.bf16.msra.mxu1 %v4003_v10  ;;  %3876 = vmatprep.mubr.msk.f32.mxu1 %vm4161_vm1, %v4157_v2 }
 0x94f   :  { %4008 = vmatprep.subr.bf16.mxu1 %v4162_v45 }
 0x98f   :  { %v2503_v21 = vpop.xlane.xlu1 %2502 }
 0x990   :  { %4137 = vrcp.f32 %v2503_v21  ;;  %v2500_v54 = vpop.xlane.xlu0 %2499 }
 0x991   :  { %4139 = vrcp.f32 %v2500_v54 }
 0x997   :  { %v2509_v55 = vpop.xlane.xlu1 %2508 }
 0x998   :  { %4141 = vrcp.f32 %v2509_v55  ;;  %v2506_v58 = vpop.xlane.xlu0 %2505 }
 0x999   :  { %4143 = vrcp.f32 %v2506_v58 }
 0x99a   :  { %v4138_v59 = vpop.eup %4137 }
 0x99b   :  { %v4140_v60 = vpop.eup %4139  ;;  %v2527_v61 = vmul.f32 %v4138_v59, %v4625_v47 }
 0x99c   :  { %v2526_v63 = vmul.f32 %v4140_v60, %v4627_v49 }
 0x99d   :  { %3877 = vmatmul.mubr.msk.f32.vlgmr.msra.gmra.mrb[30].mxu1 %vm2443_vm4, %v2527_v61 }
 0x99e   :  { %4010 = vmatpush3.bf16.msra.mxu1 %v4009_v62  ;;  %3870 = vmatmul.mubr.msk.f32.vlgmr.msra.gmra.mrb[32].mxu0 %vm2443_vm4, %v2526_v63 }
 0x99f   :  { %v2515_v1 = vpop.xlane.xlu1 %2514  ;;  %4007 = vmatpush3.bf16.msra.mxu0 %v4006_v0  ;;  %3890 = vmatprep.mubr.msk.f32.mxu1 %vm4161_vm1, %v4157_v2 }
 0x9a0   :  { %4145 = vrcp.f32 %v2515_v1  ;;  %v2512_v3 = vpop.xlane.xlu0 %2511  ;;  %3883 = vmatprep.mubr.msk.f32.mxu0 %vm4161_vm1, %v4157_v2  ;;  %4011 = vmatprep.subr.bf16.mxu0 %v4162_v45 }
 0x9a1   :  { %4147 = vrcp.f32 %v2512_v3  ;;  %4014 = vmatprep.subr.bf16.mxu1 %v4162_v45 }
 0x9a2   :  { %v4142_v4 = vpop.eup %4141 }
 0x9a3   :  { %v4144_v5 = vpop.eup %4143  ;;  %v2529_v6 = vmul.f32 %v4142_v4, %v4633_v30  ;;  %v4073_v11 = vpop.permute.xlu1 %4072  ;;  %v3179_v4 = vld [vmem:[%s4803_s4 + $0x8] sm:$0xff] }
 0x9a4   :  { %v2528_v12 = vmul.f32 %v4144_v5, %v4635_v31  ;;  %v4075_v13 = vunpack.i.h.bf16 %v4073_v11  ;;  %v4074_v14 = vunpack.i.l.bf16 %v4073_v11  ;;  %v4078_v17 = vpop.permute.xlu0 %4077  ;;  %v3181_v11 = vld [vmem:[%s4803_s4 + $0x18] sm:$0xff] }
 0x9a5   :  { %v4080_v18 = vunpack.i.h.bf16 %v4078_v17  ;;  %v4079_v19 = vunpack.i.l.bf16 %v4078_v17  ;;  %3891 = vmatmul.mubr.msk.f32.vlgmr.msra.gmra.mrb[32].mxu1 %vm2443_vm4, %v2529_v6  ;;  %v3180_v6 = vld [vmem:[%s4803_s4 + $0x10] sm:$0xff] }
 0x9a6   :  { %v4012_v47 = vpack.c.bf16 %v4075_v13, %v4074_v14  ;;  %3884 = vmatmul.mubr.msk.f32.vlgmr.msra.gmra.mrb[34].mxu0 %vm2443_vm4, %v2528_v12  ;;  %3904 = vmatprep.mubr.msk.f32.mxu1 %vm4161_vm1, %v4157_v2  ;;  %v4021_v12 = vpack.c.bf16 %v3181_v11, %v3180_v6  ;;  %v3272_v13 = vld [vmem:[%s4804_s6] sm:$0xff]  ;;  %v3273_v14 = vld [vmem:[%s4804_s6 + $0x8] sm:$0xff]  ;;  %v3274_v17 = vld [vmem:[%s4804_s6 + $0x10] sm:$0xff] }
 0x9a7   :  { %v4015_v45 = vpack.c.bf16 %v4080_v18, %v4079_v19  ;;  %3897 = vmatprep.mubr.msk.f32.mxu0 %vm4161_vm1, %v4157_v2  ;;  %v4025_v18 = vpack.c.bf16 %v3273_v14, %v3272_v13  ;;  %v3275_v19 = vld [vmem:[%s4804_s6 + $0x18] sm:$0xff]  ;;  %v3574_v6 = vld [vmem:[%s4802_s7 + $0x7] ss:$0 sm:$0xff]  ;;  %v3575_v13 = vld [vmem:[%s4802_s7 + $0x8] ss:$0 sm:$0xff] }
 0x9a8   :  { %4013 = vmatpush3.bf16.msra.mxu0 %v4012_v47  ;;  %v4029_v47 = vpack.c.bf16 %v3275_v19, %v3274_v17 }
 0x9a9   :  { %4016 = vmatpush3.bf16.msra.mxu1 %v4015_v45  ;;  %v3276_v45 = vld [vmem:[%s4804_s6 + $0x20] sm:$0xff] }
 0x9aa   :  { %v4146_v49 = vpop.eup %4145  ;;  %4026 = vmatprep.subr.bf16.mxu1 %v4025_v18 }
 0x9ab   :  { %v4148_v20 = vpop.eup %4147  ;;  %v2531_v23 = vmul.f32 %v4146_v49, %v4642_v8  ;;  %v3277_v49 = vld [vmem:[%s4804_s6 + $0x28] sm:$0xff] }
 0x9ac   :  { %v2530_v24 = vmul.f32 %v4148_v20, %v4644_v9  ;;  %v4033_v20 = vpack.c.bf16 %v3277_v49, %v3276_v45 }
 0x9ad   :  { %3905 = vmatmul.mubr.msk.f32.vlgmr.msra.gmra.mrb[34].mxu1 %vm2443_vm4, %v2531_v23 }
 0x9ae   :  { %3898 = vmatmul.mubr.msk.f32.vlgmr.msra.gmra.mrb[36].mxu0 %vm2443_vm4, %v2530_v24  ;;  %4028 = vmatpush3.bf16.msra.mxu1 %v4025_v18 }
 0x9af   :  { %4030 = vmatprep.subr.bf16.mxu1 %v4029_v47 }
 0x9b2   :  { %4032 = vmatpush3.bf16.msra.mxu1 %v4029_v47 }
 0x9b3   :  { %4034 = vmatprep.subr.bf16.mxu1 %v4033_v20 }
 0x9b6   :  { %4036 = vmatpush3.bf16.msra.mxu1 %v4033_v20 }
 0xa1c   :  { %v2601_v25 = vpop.f32.mrb[26].mxu1 }
 0xa1d   :  { %v3857_v26 = vpop.f32.mrb[27].mxu1  ;;  %v3116_v30 = vsel %vm183_vm0, %v2601_v25, 0.0 }
 0xa20   :  { %v2674_v27 = vpop.f32.mrb[28].mxu1 }
 0xa21   :  { %v3864_v35 = vpop.f32.mrb[29].mxu1  ;;  %v3123_v48 = vsel %vm183_vm0, %v2674_v27, 0.0 }
 0xa70   :  { %v2820_v46 = vpop.f32.mrb[30].mxu1 }
 0xa71   :  { %v3124_v2 = vsel %vm183_vm0, %v2820_v46, 0.0  ;;  %v2747_v28 = vpop.f32.mrb[32].mxu0  ;;  %v3878_v29 = vpop.f32.mrb[31].mxu1 }
 0xa72   :  { %v3125_v31 = vadd.f32 %v3124_v2, %v3123_v48  ;;  %v3117_v32 = vsel %vm183_vm0, %v2747_v28, 0.0  ;;  %v3871_v33 = vpop.f32.mrb[33].mxu0  ;;  %v3566_v48 = vld [vmem:[%s4802_s7 + $0x5] ss:$0 sm:$0xff] }
 0xa73   :  { %v3118_v7 = vadd.f32 %v3117_v32, %v3116_v30  ;;  %v3567_v30 = vld [vmem:[%s4802_s7 + $0x6] ss:$0 sm:$0xff] }
 0xa78   :  { %v2966_v8 = vpop.f32.mrb[32].mxu1 }
 0xa79   :  { %v3126_v9 = vsel %vm183_vm0, %v2966_v8, 0.0  ;;  %v2893_v34 = vpop.f32.mrb[34].mxu0  ;;  %v3892_v36 = vpop.f32.mrb[33].mxu1  ;;  %v3278_v8 = vld [vmem:[%s4804_s6 + $0x30] sm:$0xff] }
 0xa7a   :  { %v3127_v37 = vadd.f32 %v3126_v9, %v3125_v31  ;;  %v3119_v38 = vsel %vm183_vm0, %v2893_v34, 0.0  ;;  %v3885_v39 = vpop.f32.mrb[35].mxu0  ;;  %v3279_v9 = vld [vmem:[%s4804_s6 + $0x38] sm:$0xff]  ;;  %v3568_v36 = vld [vmem:[%s4805_s5] ss:$0 sm:$0xff] }
 0xa7b   :  { %v3120_v40 = vadd.f32 %v3119_v38, %v3118_v7  ;;  %v4037_v34 = vpack.c.bf16 %v3279_v9, %v3278_v8 }
 0xa7d   :  { %4038 = vmatprep.subr.bf16.mxu1 %v4037_v34 }
 0xa7e   :  { %4040 = vmatpush3.bf16.msra.mxu1 %v4037_v34 }
 0xa80   :  { %v3112_v22 = vpop.f32.mrb[34].mxu1 }
 0xa81   :  { %v3128_v42 = vsel %vm183_vm0, %v3112_v22, 0.0  ;;  %v3039_v43 = vpop.f32.mrb[36].mxu0  ;;  %v3906_v44 = vpop.f32.mrb[35].mxu1 }
 0xa82   :  { %v3129_v50 = vadd.f32 %v3128_v42, %v3127_v37  ;;  %v3121_v57 = vsel %vm183_vm0, %v3039_v43, 0.0  ;;  %v3899_v10 = vpop.f32.mrb[37].mxu0  ;;  %v3573_v43 = vld [vmem:[%s4802_s7 + $0x2] ss:$0 sm:$0xff] }
 0xa83   :  { %v3122_v21 = vadd.f32 %v3121_v57, %v3120_v40 }
 0xa84   :  { %v3135_v54 = vadd.f32 %v3565_v41, %v3129_v50 }
 0xa85   :  { %v3134_v55 = vadd.f32 %v3565_v41, %v3122_v21 }
 0xa86   :  { %v3137_v56 = vadd.f32 %v3135_v54, %v4530_v16 }
 0xa87   :  { %v3136_v51 = vadd.f32 %v3134_v55, %v4528_v15  ;;  %v3178_v15 = vld [vmem:[%s4803_s4] sm:$0xff] }
 0xa88   :  { %v3143_v58 = vsel %vm183_vm0, %v3137_v56, 0.0  ;;  %v4017_v5 = vpack.c.bf16 %v3179_v4, %v3178_v15 }
 0xa89   :  { %3144 = vadd.xlane.f32.xlu0 %v3143_v58  ;;  %v3140_v52 = vsel %vm183_vm0, %v3136_v51, 0.0 }
 0xa8a   :  { %3141 = vadd.xlane.f32.xlu1 %v3140_v52  ;;  %4018 = vmatprep.subr.bf16.mxu0 %v4017_v5 }
 0xa8b   :  { %4020 = vmatpush3.bf16.msra.mxu0 %v4017_v5 }
 0xa8c   :  { %4022 = vmatprep.subr.bf16.mxu0 %v4021_v12 }
 0xa8f   :  { %4024 = vmatpush3.bf16.msra.mxu0 %v4021_v12 }
 0xb16   :  { %v3145_v53 = vpop.xlane.xlu0 %3144 }
 0xb17   :  { %v3147_v59 = vmul.f32 0.03125, %v3145_v53  ;;  %v3142_v60 = vpop.xlane.xlu1 %3141 }
 0xb18   :  { %v3146_v61 = vmul.f32 0.03125, %v3142_v60 }
 0xb19   :  { %v3149_v62 = vsub.f32 %v3137_v56, %v3147_v59 }
 0xb1a   :  { %v3148_v63 = vsub.f32 %v3136_v51, %v3146_v61 }
 0xb1b   :  { %v3151_v0 = vmul.f32 %v3149_v62, %v3149_v62 }
 0xb1c   :  { %v3150_v1 = vmul.f32 %v3148_v63, %v3148_v63 }
 0xb1d   :  { %v3155_v3 = vsel %vm183_vm0, %v3151_v0, 0.0 }
 0xb1e   :  { %3156 = vadd.xlane.f32.xlu1 %v3155_v3  ;;  %v3152_v16 = vsel %vm183_vm0, %v3150_v1, 0.0 }
 0xb1f   :  { %3153 = vadd.xlane.f32.xlu0 %v3152_v16 }
 0xbab   :  { %v3157_v23 = vpop.xlane.xlu1 %3156 }
 0xbac   :  { %v3159_v24 = vmul.f32 0.03125, %v3157_v23  ;;  %v3154_v25 = vpop.xlane.xlu0 %3153 }
 0xbad   :  { %v3158_v26 = vmul.f32 0.03125, %v3154_v25 }
 0xbae   :  { %v3161_v27 = vadd.f32 1e-05, %v3159_v24 }
 0xbaf   :  { %v3160_v35 = vadd.f32 1e-05, %v3158_v26 }
 0xbb0   :  { %4149 = vrsqrt.f32 %v3161_v27 }
 0xbb1   :  { %4151 = vrsqrt.f32 %v3160_v35 }
 0xbba   :  { %v4150_v46 = vpop.eup %4149 }
 0xbbb   :  { %v4152_v2 = vpop.eup %4151  ;;  %v3165_v28 = vmul.f32 %v4150_v46, %v3149_v62 }
 0xbbc   :  { %v3164_v29 = vmul.f32 %v4152_v2, %v3148_v63 }
 0xbbd   :  { %v3171_v31 = vmul.f32 %v3566_v48, %v3165_v28 }
 0xbbe   :  { %v3170_v32 = vmul.f32 %v3566_v48, %v3164_v29 }
 0xbbf   :  { %v3177_v7 = vadd.f32 %v3567_v30, %v3171_v31 }
 0xbc0   :  { %v3176_v33 = vadd.f32 %v3567_v30, %v3170_v32 }
 0xbc2   :  { %3915 = vmatprep.mubr.msk.f32.mxu0 %vm183_vm0, %v3176_v33 }
 0xbc3   :  { %3916 = vmatmul.mubr.msk.f32.vlgmr.msra.gmra.mrb[38].mxu0 %vm183_vm0, %v3177_v7 }
 0xc96   :  { %v3917_v37 = vpop.f32.mrb[38].mxu0 }
 0xc97   :  { %v3267_v38 = vadd.f32 %v3917_v37, %v3568_v36  ;;  %v3261_v39 = vpop.f32.mrb[39].mxu0 }
 0xc98   :  { %v3262_v40 = vadd.f32 %v3568_v36, %v3261_v39 }
 0xc99   :  { %v3271_v41 = vmax.f32 %v3267_v38, 0.0 }
 0xc9a   :  { %v3270_v22 = vmax.f32 %v3262_v40, 0.0 }
 0xc9c   :  { %3934 = vmatprep.mubr.msk.f32.mxu1 %vm3280_vm5, %v3270_v22 }
 0xc9d   :  { %3935 = vmatmul.mubr.msk.f32.vlgmr.msra.gmra.mrb[36].mxu1 %vm3280_vm5, %v3271_v41 }
 0xd70   :  { %v3936_v42 = vpop.f32.mrb[36].mxu1 }
 0xd71   :  { %v3363_v44 = vadd.f32 %v3936_v42, %v3177_v7  ;;  %v3353_v50 = vpop.f32.mrb[37].mxu1 }
 0xd72   :  { %v3362_v57 = vadd.f32 %v3353_v50, %v3176_v33 }
 0xd73   :  { %v3370_v10 = vadd.f32 %v3573_v43, %v3363_v44 }
 0xd74   :  { %v3369_v21 = vadd.f32 %v3573_v43, %v3362_v57 }
 0xd75   :  { %v3376_v54 = vsel %vm183_vm0, %v3370_v10, 0.0 }
 0xd76   :  { %3377 = vadd.xlane.f32.xlu1 %v3376_v54  ;;  %v3373_v55 = vsel %vm183_vm0, %v3369_v21, 0.0 }
 0xd77   :  { %3374 = vadd.xlane.f32.xlu0 %v3373_v55 }
 0xe03   :  { %v3378_v56 = vpop.xlane.xlu1 %3377 }
 0xe04   :  { %v3380_v51 = vmul.f32 0.03125, %v3378_v56  ;;  %v3375_v58 = vpop.xlane.xlu0 %3374 }
 0xe05   :  { %v3379_v52 = vmul.f32 0.03125, %v3375_v58 }
 0xe06   :  { %v3382_v53 = vsub.f32 %v3370_v10, %v3380_v51 }
 0xe07   :  { %v3381_v59 = vsub.f32 %v3369_v21, %v3379_v52 }
 0xe08   :  { %v3384_v60 = vmul.f32 %v3382_v53, %v3382_v53 }
 0xe09   :  { %v3383_v61 = vmul.f32 %v3381_v59, %v3381_v59 }
 0xe0a   :  { %v3388_v62 = vsel %vm183_vm0, %v3384_v60, 0.0 }
 0xe0b   :  { %3389 = vadd.xlane.f32.xlu1 %v3388_v62  ;;  %v3385_v63 = vsel %vm183_vm0, %v3383_v61, 0.0 }
 0xe0c   :  { %3386 = vadd.xlane.f32.xlu0 %v3385_v63 }
 0xe98   :  { %v3390_v0 = vpop.xlane.xlu1 %3389 }
 0xe99   :  { %v3392_v1 = vmul.f32 0.03125, %v3390_v0  ;;  %v3387_v3 = vpop.xlane.xlu0 %3386 }
 0xe9a   :  { %v3391_v16 = vmul.f32 0.03125, %v3387_v3 }
 0xe9b   :  { %v3394_v15 = vadd.f32 1e-05, %v3392_v1 }
 0xe9c   :  { %v3393_v4 = vadd.f32 1e-05, %v3391_v16 }
 0xe9d   :  { %4153 = vrsqrt.f32 %v3394_v15 }
 0xe9e   :  { %4155 = vrsqrt.f32 %v3393_v4 }
 0xea7   :  { %v4154_v5 = vpop.eup %4153 }
 0xea8   :  { %v4156_v11 = vpop.eup %4155  ;;  %v3398_v12 = vmul.f32 %v4154_v5, %v3382_v53 }
 0xea9   :  { %v3397_v14 = vmul.f32 %v4156_v11, %v3381_v59 }
 0xeaa   :  { %v3404_v17 = vmul.f32 %v3574_v6, %v3398_v12 }
 0xeab   :  { %v3403_v18 = vmul.f32 %v3574_v6, %v3397_v14 }
 0xeac   :  { %v3410_v19 = vadd.f32 %v3575_v13, %v3404_v17 }
 0xead   :  { %v3409_v47 = vadd.f32 %v3575_v13, %v3403_v18 }
 0xeae   :  { %3447 = vxpose.xlu1.b32.start.end [1/1] (short) (narrow) %v3410_v19, 32 }
 0xeaf   :  { %3411 = vxpose.xlu0.b32.start.end [1/1] (short) (narrow) %v3409_v47, 32 }
 0xf2e   :  { %v3463_v45 = vpop.trf.xlu1 }
 0xf2f   :  { %3576 = vst.msk [vmem:[%s4806_s8 + $0x20] sm:$0xff] %vm1026_vm2, %v3463_v45  ;;  %v3427_v49 = vpop.trf.xlu0 }
 0xf30   :  { %3443 = vst.msk [vmem:[%s4806_s8] sm:$0xff] %vm1026_vm2, %v3427_v49 }
 0xf32   :  { %v3464_v20 = vpop.trf.xlu1 }
 0xf33   :  { %3577 = vst.msk [vmem:[%s4806_s8 + $0x28] sm:$0xff] %vm1026_vm2, %v3464_v20  ;;  %v3428_v23 = vpop.trf.xlu0 }
 0xf34   :  { %3444 = vst.msk [vmem:[%s4806_s8 + $0x8] sm:$0xff] %vm1026_vm2, %v3428_v23 }
 0xf36   :  { %v3465_v24 = vpop.trf.xlu1 }
 0xf37   :  { %3578 = vst.msk [vmem:[%s4806_s8 + $0x30] sm:$0xff] %vm1026_vm2, %v3465_v24  ;;  %v3429_v25 = vpop.trf.xlu0 }
 0xf38   :  { %3445 = vst.msk [vmem:[%s4806_s8 + $0x10] sm:$0xff] %vm1026_vm2, %v3429_v25 }
 0xf3a   :  { %v3466_v26 = vpop.trf.xlu1 }
 0xf3b   :  { %3579 = vst.msk [vmem:[%s4806_s8 + $0x38] sm:$0xff] %vm1026_vm2, %v3466_v26  ;;  %v3430_v27 = vpop.trf.xlu0 }
 0xf3c   :  { %3446 = vst.msk [vmem:[%s4806_s8 + $0x18] sm:$0xff] %vm1026_vm2, %v3430_v27 }

</bundles_post_ra>
